<compile_context>
chip_gen: v5e
topology: v5e:2x2
jax: 0.10.0
libtpu: 0.0.40
codegen_flags: <defaults>
</compile_context>

<pallas_src>
import functools

import jax
import jax.numpy as jnp
from jax.experimental import pallas as pl
from jax.experimental.pallas import tpu as pltpu


def _attention_kernel(enc_ref, dec_ref, we_ref, be_ref, wd_ref, bd_ref,
                      wf_ref, awe_ref, alpha_ref, *, num_pixels,
                      approx_softmax):
    TB, P_pad, E = enc_ref.shape
    A = we_ref.shape[1]

    enc = enc_ref[...]                                        # (TB, P_pad, E)
    dec = dec_ref[...]                                        # (TB, D)

    # att1 = encoder_att(encoder_out): flattened (TB*P_pad, E) x (E, A) GEMM.
    # P_pad is a multiple of the sublane packing, so this reshape is free.
    att1 = jnp.dot(enc.reshape(TB * P_pad, E), we_ref[...],
                   preferred_element_type=jnp.float32)        # (TB*P_pad, A)
    att1 = att1.reshape(TB, P_pad, A)

    # att2 = decoder_att(decoder_hidden); both biases folded in once per tile
    # (independent of the pixel axis).
    att2 = (jnp.dot(dec, wd_ref[...], preferred_element_type=jnp.float32)
            + be_ref[...] + bd_ref[...])                      # (TB, A)

    # relu(att1 + att2.unsqueeze(1)); dropout == identity (eval mode).
    h = jnp.maximum(att1 + att2[:, None, :], 0.0)             # (TB, P_pad, A)

    # full_att as broadcast-row multiply + lane reduce over A -> (TB, P_pad).
    # b_full omitted: a constant shift cancels in the softmax.
    scores = jnp.sum(h * wf_ref[...], axis=-1)                # (TB, P_pad)

    # Mask padded pixels so they receive zero attention weight.
    if num_pixels != P_pad:
        pix = jax.lax.broadcasted_iota(jnp.int32, (TB, P_pad), 1)
        scores = jnp.where(pix < num_pixels, scores, -jnp.inf)

    # softmax over the pixel axis, lane-dense layout.
    m = jnp.max(scores, axis=-1, keepdims=True)               # (TB, 1)
    e = jnp.exp(scores - m)                                   # (TB, P_pad)
    s = jnp.sum(e, axis=-1, keepdims=True)                    # (TB, 1)
    if approx_softmax:
        alpha = e * pl.reciprocal(s, approx=True)
    else:
        alpha = e / s

    # (encoder_out * alpha.unsqueeze(2)).sum(dim=1) -> (TB, E); padded pixels
    # contribute nothing (alpha == 0 there and enc padding is zero).
    awe = jnp.sum(enc.astype(jnp.float32) * alpha[:, :, None], axis=1)
    awe_ref[...] = awe.astype(awe_ref.dtype)
    alpha_ref[...] = alpha.astype(alpha_ref.dtype)            # lane-dense store


def _round_up(x, m):
    return (x + m - 1) // m * m


def _pick_batch_tile(B, P_pad, E, D, A, enc_bytes, vmem_budget):
    """8-aligned batch tile sized to fill (not exceed) the VMEM budget."""
    # Stationary weights (worst case: double-buffered) + biases.
    fixed = 2 * (E * A * enc_bytes + D * A * 4 + 3 * A * 4)
    # Per batch-row cost: double-buffered enc block + f32 intermediates
    # (att1 / h / weighted-enc temporaries) + dec/awe/alpha blocks + att2.
    per_row = (2 * P_pad * E * enc_bytes
               + 3 * P_pad * A * 4
               + 2 * (D + E + P_pad) * 4
               + A * 4)
    avail = max(vmem_budget - fixed, per_row * 8)
    tb = max(8, int(avail // per_row) // 8 * 8)
    # Keep the encoder block itself in the ~4-12 MB sweet spot (HBM roofline).
    cap = max(8, (12 << 20) // (P_pad * E * enc_bytes) // 8 * 8)
    tb = min(tb, cap)
    # Never exceed the padded batch.
    tb = min(tb, _round_up(B, 8))
    # Prefer >= 2 grid steps (megacore / v7x dual TensorCore) when B allows.
    while tb > 8 and B > 8 and (B + tb - 1) // tb < 2:
        tb = max(8, (tb // 2) // 8 * 8)
    return tb


def attention_forward(encoder_out, decoder_hidden, params, *, batch_tile=None,
                      use_bf16=False, approx_softmax=False,
                      single_buffer_weights=True):
    """encoder_out: (B, P, E), decoder_hidden: (B, D).

    Returns (attention_weighted_encoding (B, E), alpha (B, P)), both f32.
    """
    B, P, E = encoder_out.shape
    D = decoder_hidden.shape[1]
    A = params["w_enc"].shape[1]

    w_enc, b_enc = params["w_enc"], params["b_enc"]     # (E, A), (1, A)
    w_dec, b_dec = params["w_dec"], params["b_dec"]     # (D, A), (1, A)
    w_full = params["w_full"]                           # (1, A); b_full unused

    enc = encoder_out
    if use_bf16:  # production knob; breaks the 1e-5 f32 harness tolerance
        enc = enc.astype(jnp.bfloat16)
        w_enc = w_enc.astype(jnp.bfloat16)
    enc_bytes = jnp.dtype(enc.dtype).itemsize

    # Pad pixels to the sublane packing of the enc dtype (8 for f32, 16 bf16).
    sub = 8 * max(1, 4 // enc_bytes)
    P_pad = _round_up(P, sub)

    # Generation-aware VMEM budget (v7x: 64 MiB/TC, v5e/v6e: 128 MiB).
    try:
        vmem_cap = int(pltpu.get_tpu_info().vmem_capacity_bytes)
    except Exception:
        vmem_cap = 64 * 1024 * 1024
    vmem_limit = int(vmem_cap * 3 // 4)       # leave headroom for the compiler
    budget = max(vmem_limit - (4 << 20), 8 << 20)

    TB = (batch_tile if batch_tile is not None
          else _pick_batch_tile(B, P_pad, E, D, A, enc_bytes, budget))
    B_pad = _round_up(B, TB)

    dec = decoder_hidden
    if B_pad != B:
        dec = jnp.pad(dec, ((0, B_pad - B), (0, 0)))
    if B_pad != B or P_pad != P:
        enc = jnp.pad(enc, ((0, B_pad - B), (0, P_pad - P), (0, 0)))

    kernel = functools.partial(_attention_kernel, num_pixels=P,
                               approx_softmax=approx_softmax)

    def build(single_buffer):
        # Stationary weights: constant index_map; single-buffer if supported.
        wkw = {"pipeline_mode": pl.Buffered(1)} if single_buffer else {}
        return pl.pallas_call(
            kernel,
            out_shape=(
                jax.ShapeDtypeStruct((B_pad, E), jnp.float32),
                jax.ShapeDtypeStruct((B_pad, P_pad), jnp.float32),
            ),
            grid_spec=pltpu.PrefetchScalarGridSpec(
                num_scalar_prefetch=0,
                grid=(B_pad // TB,),
                in_specs=[
                    pl.BlockSpec((TB, P_pad, E), lambda b: (b, 0, 0)),
                    pl.BlockSpec((TB, D), lambda b: (b, 0)),
                    pl.BlockSpec((E, A), lambda b: (0, 0), **wkw),
                    pl.BlockSpec((1, A), lambda b: (0, 0), **wkw),
                    pl.BlockSpec((D, A), lambda b: (0, 0), **wkw),
                    pl.BlockSpec((1, A), lambda b: (0, 0), **wkw),
                    pl.BlockSpec((1, A), lambda b: (0, 0), **wkw),
                ],
                out_specs=[
                    pl.BlockSpec((TB, E), lambda b: (b, 0)),
                    pl.BlockSpec((TB, P_pad), lambda b: (b, 0)),
                ],
            ),
            compiler_params=pltpu.CompilerParams(
                dimension_semantics=("parallel",),
                vmem_limit_bytes=vmem_limit),
        )

    args = (enc, dec, w_enc, b_enc, w_dec, b_dec, w_full)
    if single_buffer_weights:
        try:
            awe, alpha = build(True)(*args)
        except Exception:
            # pipeline_mode=pl.Buffered(1) unsupported on this jax build:
            # fall back to default double-buffered stationary weights.
            awe, alpha = build(False)(*args)
    else:
        awe, alpha = build(False)(*args)

    return awe[:B], alpha[:B, :P]


def init_params(key, encoder_dim, decoder_dim, attention_dim):
    """Deterministic synthetic parameters (shapes match the nn.Linear layers)."""
    ks = jax.random.split(key, 6)
    scale_e = 1.0 / jnp.sqrt(encoder_dim)
    scale_d = 1.0 / jnp.sqrt(decoder_dim)
    scale_a = 1.0 / jnp.sqrt(attention_dim)
    return {
        # stored transposed: (in_features, out_features)
        "w_enc": jax.random.uniform(ks[0], (encoder_dim, attention_dim),
                                    jnp.float32, -scale_e, scale_e),
        "b_enc": jax.random.uniform(ks[1], (1, attention_dim),
                                    jnp.float32, -scale_e, scale_e),
        "w_dec": jax.random.uniform(ks[2], (decoder_dim, attention_dim),
                                    jnp.float32, -scale_d, scale_d),
        "b_dec": jax.random.uniform(ks[3], (1, attention_dim),
                                    jnp.float32, -scale_d, scale_d),
        # full_att kept as a row vector (1, A); bias (1, 1) (no-op for outputs)
        "w_full": jax.random.uniform(ks[4], (1, attention_dim),
                                     jnp.float32, -scale_a, scale_a),
        "b_full": jax.random.uniform(ks[5], (1, 1),
                                     jnp.float32, -scale_a, scale_a),
    }


def _reference(encoder_out, decoder_hidden, params):
    att1 = encoder_out @ params["w_enc"] + params["b_enc"]          # (B, P, A)
    att2 = decoder_hidden @ params["w_dec"] + params["b_dec"]       # (B, A)
    h = jax.nn.relu(att1 + att2[:, None, :])
    att = jnp.sum(h * params["w_full"], axis=-1) + params["b_full"][0, 0]
    alpha = jax.nn.softmax(att, axis=1)                             # (B, P)
    awe = jnp.sum(encoder_out * alpha[:, :, None], axis=1)          # (B, E)
    return awe, alpha


def _run_case(key, B, P, encoder_dim, decoder_dim, attention_dim):
    k_enc, k_dec, k_par = jax.random.split(key, 3)
    encoder_out = jax.random.normal(k_enc, (B, P, encoder_dim), jnp.float32)
    decoder_hidden = jax.random.normal(k_dec, (B, decoder_dim), jnp.float32)
    params = init_params(k_par, encoder_dim, decoder_dim, attention_dim)

    awe, alpha = attention_forward(encoder_out, decoder_hidden, params)
    awe = jax.block_until_ready(awe)
    alpha = jax.block_until_ready(alpha)

    awe_ref, alpha_ref = _reference(encoder_out, decoder_hidden, params)
    assert awe.shape == (B, encoder_dim) and alpha.shape == (B, P)
    assert jnp.allclose(awe, awe_ref, atol=1e-5, rtol=1e-5), \
        float(jnp.max(jnp.abs(awe - awe_ref)))
    assert jnp.allclose(alpha, alpha_ref, atol=1e-5, rtol=1e-5), \
        float(jnp.max(jnp.abs(alpha - alpha_ref)))


if __name__ == "__main__":
    key = jax.random.PRNGKey(0)
    k1, k2 = jax.random.split(key)

    # Case 1: small shapes consistent with the module; B=4 is padded up to the
    # 8-aligned batch tile and sliced back.
    _run_case(k1, B=4, P=8, encoder_dim=32, decoder_dim=16, attention_dim=32)

    # Case 2: exercises pixel padding + softmax masking (P=12 -> 16) and batch
    # padding (B=5 -> 8).
    _run_case(k2, B=5, P=12, encoder_dim=48, decoder_dim=16, attention_dim=40)

    print("KERNEL_OK")
</pallas_src>

<mosaic_0001>
module attributes {stable_mosaic.version = 11 : i64} {
  func.func @_attention_kernel(%arg0: i32, %arg1: memref<8x8x32xf32, #tpu.memory_space<vmem>>, %arg2: memref<8x16xf32, #tpu.memory_space<vmem>>, %arg3: memref<32x32xf32, #tpu.memory_space<vmem>>, %arg4: memref<1x32xf32, #tpu.memory_space<vmem>>, %arg5: memref<16x32xf32, #tpu.memory_space<vmem>>, %arg6: memref<1x32xf32, #tpu.memory_space<vmem>>, %arg7: memref<1x32xf32, #tpu.memory_space<vmem>>, %arg8: memref<8x32xf32, #tpu.memory_space<vmem>>, %arg9: memref<8x8xf32, #tpu.memory_space<vmem>>) attributes {dimension_semantics = [#tpu.dimension_semantics<parallel>], iteration_bounds = array<i64: 1>, scalar_prefetch = 0 : i64, scratch_operands = 0 : i64, tpu.core_type = #tpu.core_type<tc>, window_params = [{transform_indices = @transform_0, window_bounds = array<i64: 8, 8, 32>}, {transform_indices = @transform_1, window_bounds = array<i64: 8, 16>}, {pipeline_mode = #tpu.pipeline_mode<synchronous>, transform_indices = @transform_2, window_bounds = array<i64: 32, 32>}, {pipeline_mode = #tpu.pipeline_mode<synchronous>, transform_indices = @transform_3, window_bounds = array<i64: 1, 32>}, {pipeline_mode = #tpu.pipeline_mode<synchronous>, transform_indices = @transform_4, window_bounds = array<i64: 16, 32>}, {pipeline_mode = #tpu.pipeline_mode<synchronous>, transform_indices = @transform_5, window_bounds = array<i64: 1, 32>}, {pipeline_mode = #tpu.pipeline_mode<synchronous>, transform_indices = @transform_6, window_bounds = array<i64: 1, 32>}, {transform_indices = @transform_7, window_bounds = array<i64: 8, 32>}, {transform_indices = @transform_8, window_bounds = array<i64: 8, 8>}]} {
    %c0 = arith.constant 0 : index
    %c0_0 = arith.constant 0 : index
    %c0_1 = arith.constant 0 : index
    %0 = vector.load %arg1[%c0, %c0_0, %c0_1] : memref<8x8x32xf32, #tpu.memory_space<vmem>>, vector<8x8x32xf32>
    %c0_2 = arith.constant 0 : index
    %c0_3 = arith.constant 0 : index
    %1 = vector.load %arg2[%c0_2, %c0_3] : memref<8x16xf32, #tpu.memory_space<vmem>>, vector<8x16xf32>
    %2 = vector.shape_cast %0 : vector<8x8x32xf32> to vector<64x32xf32>
    %c0_4 = arith.constant 0 : index
    %c0_5 = arith.constant 0 : index
    %3 = vector.load %arg3[%c0_4, %c0_5] : memref<32x32xf32, #tpu.memory_space<vmem>>, vector<32x32xf32>
    %cst = arith.constant dense<0.000000e+00> : vector<64x32xf32>
    %4 = tpu.matmul %2, %3, %cst {dimension_numbers = #tpu.dot_dimension_numbers<[1], [0], [0], [1], [0, 0, 1, 1], [], []>} : vector<64x32xf32>, vector<32x32xf32>, vector<64x32xf32> -> vector<64x32xf32>
    %5 = vector.shape_cast %4 : vector<64x32xf32> to vector<8x8x32xf32>
    %c0_6 = arith.constant 0 : index
    %c0_7 = arith.constant 0 : index
    %6 = vector.load %arg5[%c0_6, %c0_7] : memref<16x32xf32, #tpu.memory_space<vmem>>, vector<16x32xf32>
    %cst_8 = arith.constant dense<0.000000e+00> : vector<8x32xf32>
    %7 = tpu.matmul %1, %6, %cst_8 {dimension_numbers = #tpu.dot_dimension_numbers<[1], [0], [0], [1], [0, 0, 1, 1], [], []>} : vector<8x16xf32>, vector<16x32xf32>, vector<8x32xf32> -> vector<8x32xf32>
    %c0_9 = arith.constant 0 : index
    %c0_10 = arith.constant 0 : index
    %8 = vector.load %arg4[%c0_9, %c0_10] : memref<1x32xf32, #tpu.memory_space<vmem>>, vector<1x32xf32>
    %9 = vector.broadcast %8 : vector<1x32xf32> to vector<8x32xf32>
    %10 = arith.addf %7, %9 : vector<8x32xf32>
    %c0_11 = arith.constant 0 : index
    %c0_12 = arith.constant 0 : index
    %11 = vector.load %arg6[%c0_11, %c0_12] : memref<1x32xf32, #tpu.memory_space<vmem>>, vector<1x32xf32>
    %12 = vector.broadcast %11 : vector<1x32xf32> to vector<8x32xf32>
    %13 = arith.addf %10, %12 : vector<8x32xf32>
    %14 = vector.shape_cast %13 : vector<8x32xf32> to vector<8x1x32xf32>
    %15 = vector.broadcast %14 : vector<8x1x32xf32> to vector<8x8x32xf32>
    %16 = arith.addf %5, %15 : vector<8x8x32xf32>
    %cst_13 = arith.constant 0.000000e+00 : f32
    %17 = vector.broadcast %cst_13 : f32 to vector<8x8x32xf32>
    %18 = arith.maximumf %16, %17 : vector<8x8x32xf32>
    %c0_14 = arith.constant 0 : index
    %c0_15 = arith.constant 0 : index
    %19 = vector.load %arg7[%c0_14, %c0_15] : memref<1x32xf32, #tpu.memory_space<vmem>>, vector<1x32xf32>
    %20 = vector.shape_cast %19 : vector<1x32xf32> to vector<1x1x32xf32>
    %21 = vector.broadcast %20 : vector<1x1x32xf32> to vector<8x8x32xf32>
    %22 = arith.mulf %18, %21 : vector<8x8x32xf32>
    %cst_16 = arith.constant dense<0.000000e+00> : vector<8x8xf32>
    %23 = vector.multi_reduction <add>, %22, %cst_16 [2] : vector<8x8x32xf32> to vector<8x8xf32>
    %cst_17 = arith.constant dense<0xFF800000> : vector<8xf32>
    %24 = vector.multi_reduction <maximumf>, %23, %cst_17 [1] : vector<8x8xf32> to vector<8xf32>
    %25 = vector.shape_cast %24 : vector<8xf32> to vector<8x1xf32>
    %26 = vector.broadcast %25 : vector<8x1xf32> to vector<8x8xf32>
    %27 = arith.subf %23, %26 : vector<8x8xf32>
    %28 = math.exp %27 : vector<8x8xf32>
    %cst_18 = arith.constant dense<0.000000e+00> : vector<8xf32>
    %29 = vector.multi_reduction <add>, %28, %cst_18 [1] : vector<8x8xf32> to vector<8xf32>
    %30 = vector.shape_cast %29 : vector<8xf32> to vector<8x1xf32>
    %31 = vector.broadcast %30 : vector<8x1xf32> to vector<8x8xf32>
    %32 = arith.divf %28, %31 : vector<8x8xf32>
    %33 = vector.shape_cast %32 : vector<8x8xf32> to vector<8x8x1xf32>
    %34 = vector.broadcast %33 : vector<8x8x1xf32> to vector<8x8x32xf32>
    %35 = arith.mulf %0, %34 : vector<8x8x32xf32>
    %cst_19 = arith.constant dense<0.000000e+00> : vector<8x32xf32>
    %36 = vector.multi_reduction <add>, %35, %cst_19 [1] : vector<8x8x32xf32> to vector<8x32xf32>
    %c0_20 = arith.constant 0 : index
    %c0_21 = arith.constant 0 : index
    %37 = vector.load %arg8[%c0_20, %c0_21] : memref<8x32xf32, #tpu.memory_space<vmem>>, vector<8x32xf32>
    tpu.vector_store %arg8[%c0_20, %c0_21], %36 {strides = array<i32>} : memref<8x32xf32, #tpu.memory_space<vmem>>, vector<8x32xf32>,
    %c0_22 = arith.constant 0 : index
    %c0_23 = arith.constant 0 : index
    %38 = vector.load %arg9[%c0_22, %c0_23] : memref<8x8xf32, #tpu.memory_space<vmem>>, vector<8x8xf32>
    tpu.vector_store %arg9[%c0_22, %c0_23], %32 {strides = array<i32>} : memref<8x8xf32, #tpu.memory_space<vmem>>, vector<8x8xf32>,
    return
  }
  func.func @transform_0(%arg0: i32) -> (i32, i32, i32) {
    %c0_i32 = arith.constant 0 : i32
    %c0_i32_0 = arith.constant 0 : i32
    %c0_i32_1 = arith.constant 0 : i32
    return %arg0, %c0_i32, %c0_i32_0 : i32, i32, i32
  }
  func.func @transform_1(%arg0: i32) -> (i32, i32) {
    %c0_i32 = arith.constant 0 : i32
    %c0_i32_0 = arith.constant 0 : i32
    return %arg0, %c0_i32 : i32, i32
  }
  func.func @transform_2(%arg0: i32) -> (i32, i32) {
    %c0_i32 = arith.constant 0 : i32
    %c0_i32_0 = arith.constant 0 : i32
    %c0_i32_1 = arith.constant 0 : i32
    return %c0_i32, %c0_i32_0 : i32, i32
  }
  func.func @transform_3(%arg0: i32) -> (i32, i32) {
    %c0_i32 = arith.constant 0 : i32
    %c0_i32_0 = arith.constant 0 : i32
    %c0_i32_1 = arith.constant 0 : i32
    return %c0_i32, %c0_i32_0 : i32, i32
  }
  func.func @transform_4(%arg0: i32) -> (i32, i32) {
    %c0_i32 = arith.constant 0 : i32
    %c0_i32_0 = arith.constant 0 : i32
    %c0_i32_1 = arith.constant 0 : i32
    return %c0_i32, %c0_i32_0 : i32, i32
  }
  func.func @transform_5(%arg0: i32) -> (i32, i32) {
    %c0_i32 = arith.constant 0 : i32
    %c0_i32_0 = arith.constant 0 : i32
    %c0_i32_1 = arith.constant 0 : i32
    return %c0_i32, %c0_i32_0 : i32, i32
  }
  func.func @transform_6(%arg0: i32) -> (i32, i32) {
    %c0_i32 = arith.constant 0 : i32
    %c0_i32_0 = arith.constant 0 : i32
    %c0_i32_1 = arith.constant 0 : i32
    return %c0_i32, %c0_i32_0 : i32, i32
  }
  func.func @transform_7(%arg0: i32) -> (i32, i32) {
    %c0_i32 = arith.constant 0 : i32
    %c0_i32_0 = arith.constant 0 : i32
    return %arg0, %c0_i32 : i32, i32
  }
  func.func @transform_8(%arg0: i32) -> (i32, i32) {
    %c0_i32 = arith.constant 0 : i32
    %c0_i32_0 = arith.constant 0 : i32
    return %arg0, %c0_i32 : i32, i32
  }
}

module attributes {stable_mosaic.version = 11 : i64} {
  func.func @_attention_kernel(%arg0: i32, %arg1: memref<8x8x32xf32, #tpu.memory_space<vmem>>, %arg2: memref<8x16xf32, #tpu.memory_space<vmem>>, %arg3: memref<32x32xf32, #tpu.memory_space<vmem>>, %arg4: memref<1x32xf32, #tpu.memory_space<vmem>>, %arg5: memref<16x32xf32, #tpu.memory_space<vmem>>, %arg6: memref<1x32xf32, #tpu.memory_space<vmem>>, %arg7: memref<1x32xf32, #tpu.memory_space<vmem>>, %arg8: memref<8x32xf32, #tpu.memory_space<vmem>>, %arg9: memref<8x8xf32, #tpu.memory_space<vmem>>) attributes {dimension_semantics = [#tpu.dimension_semantics<parallel>], iteration_bounds = array<i64: 1>, scalar_prefetch = 0 : i64, scratch_operands = 0 : i64, tpu.core_type = #tpu.core_type<tc>, window_params = [{transform_indices = @transform_0, window_bounds = array<i64: 8, 8, 32>}, {transform_indices = @transform_1, window_bounds = array<i64: 8, 16>}, {pipeline_mode = #tpu.pipeline_mode<synchronous>, transform_indices = @transform_2, window_bounds = array<i64: 32, 32>}, {pipeline_mode = #tpu.pipeline_mode<synchronous>, transform_indices = @transform_3, window_bounds = array<i64: 1, 32>}, {pipeline_mode = #tpu.pipeline_mode<synchronous>, transform_indices = @transform_4, window_bounds = array<i64: 16, 32>}, {pipeline_mode = #tpu.pipeline_mode<synchronous>, transform_indices = @transform_5, window_bounds = array<i64: 1, 32>}, {pipeline_mode = #tpu.pipeline_mode<synchronous>, transform_indices = @transform_6, window_bounds = array<i64: 1, 32>}, {transform_indices = @transform_7, window_bounds = array<i64: 8, 32>}, {transform_indices = @transform_8, window_bounds = array<i64: 8, 8>}]} {
    %c0 = arith.constant 0 : index
    %c0_0 = arith.constant 0 : index
    %c0_1 = arith.constant 0 : index
    %0 = vector.load %arg1[%c0, %c0_0, %c0_1] : memref<8x8x32xf32, #tpu.memory_space<vmem>>, vector<8x8x32xf32>
    %c0_2 = arith.constant 0 : index
    %c0_3 = arith.constant 0 : index
    %1 = vector.load %arg2[%c0_2, %c0_3] : memref<8x16xf32, #tpu.memory_space<vmem>>, vector<8x16xf32>
    %2 = vector.shape_cast %0 : vector<8x8x32xf32> to vector<64x32xf32>
    %c0_4 = arith.constant 0 : index
    %c0_5 = arith.constant 0 : index
    %3 = vector.load %arg3[%c0_4, %c0_5] : memref<32x32xf32, #tpu.memory_space<vmem>>, vector<32x32xf32>
    %cst = arith.constant dense<0.000000e+00> : vector<64x32xf32>
    %4 = tpu.matmul %2, %3, %cst {dimension_numbers = #tpu.dot_dimension_numbers<[1], [0], [0], [1], [0, 0, 1, 1], [], []>} : vector<64x32xf32>, vector<32x32xf32>, vector<64x32xf32> -> vector<64x32xf32>
    %5 = vector.shape_cast %4 : vector<64x32xf32> to vector<8x8x32xf32>
    %c0_6 = arith.constant 0 : index
    %c0_7 = arith.constant 0 : index
    %6 = vector.load %arg5[%c0_6, %c0_7] : memref<16x32xf32, #tpu.memory_space<vmem>>, vector<16x32xf32>
    %cst_8 = arith.constant dense<0.000000e+00> : vector<8x32xf32>
    %7 = tpu.matmul %1, %6, %cst_8 {dimension_numbers = #tpu.dot_dimension_numbers<[1], [0], [0], [1], [0, 0, 1, 1], [], []>} : vector<8x16xf32>, vector<16x32xf32>, vector<8x32xf32> -> vector<8x32xf32>
    %c0_9 = arith.constant 0 : index
    %c0_10 = arith.constant 0 : index
    %8 = vector.load %arg4[%c0_9, %c0_10] : memref<1x32xf32, #tpu.memory_space<vmem>>, vector<1x32xf32>
    %9 = vector.broadcast %8 : vector<1x32xf32> to vector<8x32xf32>
    %10 = arith.addf %7, %9 : vector<8x32xf32>
    %c0_11 = arith.constant 0 : index
    %c0_12 = arith.constant 0 : index
    %11 = vector.load %arg6[%c0_11, %c0_12] : memref<1x32xf32, #tpu.memory_space<vmem>>, vector<1x32xf32>
    %12 = vector.broadcast %11 : vector<1x32xf32> to vector<8x32xf32>
    %13 = arith.addf %10, %12 : vector<8x32xf32>
    %14 = vector.shape_cast %13 : vector<8x32xf32> to vector<8x1x32xf32>
    %15 = vector.broadcast %14 : vector<8x1x32xf32> to vector<8x8x32xf32>
    %16 = arith.addf %5, %15 : vector<8x8x32xf32>
    %cst_13 = arith.constant 0.000000e+00 : f32
    %17 = vector.broadcast %cst_13 : f32 to vector<8x8x32xf32>
    %18 = arith.maximumf %16, %17 : vector<8x8x32xf32>
    %c0_14 = arith.constant 0 : index
    %c0_15 = arith.constant 0 : index
    %19 = vector.load %arg7[%c0_14, %c0_15] : memref<1x32xf32, #tpu.memory_space<vmem>>, vector<1x32xf32>
    %20 = vector.shape_cast %19 : vector<1x32xf32> to vector<1x1x32xf32>
    %21 = vector.broadcast %20 : vector<1x1x32xf32> to vector<8x8x32xf32>
    %22 = arith.mulf %18, %21 : vector<8x8x32xf32>
    %cst_16 = arith.constant dense<0.000000e+00> : vector<8x8xf32>
    %23 = vector.multi_reduction <add>, %22, %cst_16 [2] : vector<8x8x32xf32> to vector<8x8xf32>
    %cst_17 = arith.constant dense<0xFF800000> : vector<8xf32>
    %24 = vector.multi_reduction <maximumf>, %23, %cst_17 [1] : vector<8x8xf32> to vector<8xf32>
    %25 = vector.shape_cast %24 : vector<8xf32> to vector<8x1xf32>
    %26 = vector.broadcast %25 : vector<8x1xf32> to vector<8x8xf32>
    %27 = arith.subf %23, %26 : vector<8x8xf32>
    %28 = math.exp %27 : vector<8x8xf32>
    %cst_18 = arith.constant dense<0.000000e+00> : vector<8xf32>
    %29 = vector.multi_reduction <add>, %28, %cst_18 [1] : vector<8x8xf32> to vector<8xf32>
    %30 = vector.shape_cast %29 : vector<8xf32> to vector<8x1xf32>
    %31 = vector.broadcast %30 : vector<8x1xf32> to vector<8x8xf32>
    %32 = arith.divf %28, %31 : vector<8x8xf32>
    %33 = vector.shape_cast %32 : vector<8x8xf32> to vector<8x8x1xf32>
    %34 = vector.broadcast %33 : vector<8x8x1xf32> to vector<8x8x32xf32>
    %35 = arith.mulf %0, %34 : vector<8x8x32xf32>
    %cst_19 = arith.constant dense<0.000000e+00> : vector<8x32xf32>
    %36 = vector.multi_reduction <add>, %35, %cst_19 [1] : vector<8x8x32xf32> to vector<8x32xf32>
    %c0_20 = arith.constant 0 : index
    %c0_21 = arith.constant 0 : index
    %37 = vector.load %arg8[%c0_20, %c0_21] : memref<8x32xf32, #tpu.memory_space<vmem>>, vector<8x32xf32>
    tpu.vector_store %arg8[%c0_20, %c0_21], %36 {strides = array<i32>} : memref<8x32xf32, #tpu.memory_space<vmem>>, vector<8x32xf32>,
    %c0_22 = arith.constant 0 : index
    %c0_23 = arith.constant 0 : index
    %38 = vector.load %arg9[%c0_22, %c0_23] : memref<8x8xf32, #tpu.memory_space<vmem>>, vector<8x8xf32>
    tpu.vector_store %arg9[%c0_22, %c0_23], %32 {strides = array<i32>} : memref<8x8xf32, #tpu.memory_space<vmem>>, vector<8x8xf32>,
    return
  }
  func.func @transform_0(%arg0: i32) -> (i32, i32, i32) {
    %c0_i32 = arith.constant 0 : i32
    %c0_i32_0 = arith.constant 0 : i32
    %c0_i32_1 = arith.constant 0 : i32
    return %arg0, %c0_i32, %c0_i32_0 : i32, i32, i32
  }
  func.func @transform_1(%arg0: i32) -> (i32, i32) {
    %c0_i32 = arith.constant 0 : i32
    %c0_i32_0 = arith.constant 0 : i32
    return %arg0, %c0_i32 : i32, i32
  }
  func.func @transform_2(%arg0: i32) -> (i32, i32) {
    %c0_i32 = arith.constant 0 : i32
    %c0_i32_0 = arith.constant 0 : i32
    %c0_i32_1 = arith.constant 0 : i32
    return %c0_i32, %c0_i32_0 : i32, i32
  }
  func.func @transform_3(%arg0: i32) -> (i32, i32) {
    %c0_i32 = arith.constant 0 : i32
    %c0_i32_0 = arith.constant 0 : i32
    %c0_i32_1 = arith.constant 0 : i32
    return %c0_i32, %c0_i32_0 : i32, i32
  }
  func.func @transform_4(%arg0: i32) -> (i32, i32) {
    %c0_i32 = arith.constant 0 : i32
    %c0_i32_0 = arith.constant 0 : i32
    %c0_i32_1 = arith.constant 0 : i32
    return %c0_i32, %c0_i32_0 : i32, i32
  }
  func.func @transform_5(%arg0: i32) -> (i32, i32) {
    %c0_i32 = arith.constant 0 : i32
    %c0_i32_0 = arith.constant 0 : i32
    %c0_i32_1 = arith.constant 0 : i32
    return %c0_i32, %c0_i32_0 : i32, i32
  }
  func.func @transform_6(%arg0: i32) -> (i32, i32) {
    %c0_i32 = arith.constant 0 : i32
    %c0_i32_0 = arith.constant 0 : i32
    %c0_i32_1 = arith.constant 0 : i32
    return %c0_i32, %c0_i32_0 : i32, i32
  }
  func.func @transform_7(%arg0: i32) -> (i32, i32) {
    %c0_i32 = arith.constant 0 : i32
    %c0_i32_0 = arith.constant 0 : i32
    return %arg0, %c0_i32 : i32, i32
  }
  func.func @transform_8(%arg0: i32) -> (i32, i32) {
    %c0_i32 = arith.constant 0 : i32
    %c0_i32_0 = arith.constant 0 : i32
    return %arg0, %c0_i32 : i32, i32
  }
}

</mosaic_0001>

<bundles_post_ra>
// kernel: tpu_custom_call.1
= control target key start
LH: loop header
LB: loop body
LE: loop exit
PB: predicated region body
PF: predicated region fallthrough
CT: control target
= control target key end

     0   :  { %14 = vsyncpa [#allocation3], 0  ;;  %s1267_s0 = inlined_call_operand.hbm [shape: f32[8,8,32], index: 0, kind: input, shape index: {}]   ;;  %s1268_s1 = inlined_call_operand.hbm [shape: f32[8,16], index: 1, kind: input, shape index: {}]   ;;  %s1269_s2 = inlined_call_operand.hbm [shape: f32[32,32], index: 2, kind: input, shape index: {}]   ;;  %s1270_s3 = inlined_call_operand.vmem [shape: f32[1,32], index: 3, kind: input, shape index: {}]   ;;  %s1271_s4 = inlined_call_operand.hbm [shape: f32[16,32], index: 4, kind: input, shape index: {}]   ;;  %s1272_s5 = inlined_call_operand.vmem [shape: f32[1,32], index: 5, kind: input, shape index: {}]   ;;  %s1273_s6 = inlined_call_operand.vmem [shape: f32[1,32], index: 6, kind: input, shape index: {}]   ;;  %s1274_s7 = inlined_call_operand.hbm [shape: f32[8,32], index: 7, kind: output, shape index: {0}]   ;;  %s1275_s8 = inlined_call_operand.hbm [shape: f32[8,8], index: 8, kind: output, shape index: {1}]  }
   0x1   :  { %15 = vsyncpa [#allocation6], 0 }
   0x2   :  { %16 = vsyncpa [#allocation9], 0 }
   0x3   :  { %17 = vsyncpa [#allocation4], 0  ;;  %s37_s29 = sshll.u32 %s1268_s1, 4  ;;  %s38_s29 = int_to_ptr.hbm [resolvable:$true] %s37_s29 }
   0x4   :  { %18 = vsyncpa [#allocation12], 0  ;;  %s938_s30 = smov [#allocation5]   ;;  %s23_s12 = sshll.u32 %s1267_s0, 4  ;;  %s24_s12 = int_to_ptr.hbm [resolvable:$true] %s23_s12 }
   0x5   :  { %s39_s9 = sshll.u32 %s938_s30, 4  ;;  %s939_s13 = smov [#allocation2]   ;;  %s40_s9 = int_to_ptr.vmem [resolvable:$true] %s39_s9 }
   0x6   :  { %42 = dma.hbm_to_vmem [thread:$0]  %s38_s29, 128, %s40_s9, [#allocation6]  }
   0x7   :  { %s25_s14 = sshll.u32 %s939_s13, 4  ;;  %s940_s15 = smov 128   ;;  %s26_s14 = int_to_ptr.vmem [resolvable:$true] %s25_s14 }
   0x8   :  { %s941_s16 = smov 8   ;;  %s47_s1 = sshll.u32 %s1269_s2, 4  ;;  %s48_s1 = int_to_ptr.hbm [resolvable:$true] %s47_s1 }
   0x9   :  { %31 = dma.hbm_to_vmem [thread:$0]  %s24_s12, 1024, %s26_s14, [#allocation3], %s940_s15, %s940_s15, %s941_s16  }
   0xa   :  { %s942_s19 = smov [#allocation7]   ;;  %s62_s0 = sshll.u32 %s1271_s4, 4  ;;  %s63_s0 = int_to_ptr.hbm [resolvable:$true] %s62_s0 }
   0xb   :  { %s49_s20 = sshll.u32 %s942_s19, 4  ;;  %s943_s23 = smov [#allocation8]   ;;  %s50_s20 = int_to_ptr.vmem [resolvable:$true] %s49_s20 }
   0xc   :  { %55 = dma.hbm_to_vmem [thread:$0]  %s48_s1, 512, %s50_s20, [#allocation6], %s940_s15, %s940_s15, %s941_s16  }
   0xd   :  { %s64_s24 = sshll.u32 %s943_s23, 4  ;;  %s65_s24 = int_to_ptr.vmem [resolvable:$true] %s64_s24 }
   0xe   :  { %70 = dma.hbm_to_vmem [thread:$0]  %s63_s0, 256, %s65_s24, [#allocation9], %s940_s15, %s940_s15, %s941_s16  }
   0xf   :  { %928 = dma.done.wait [#allocation3], 1024  }
  0x10   :  { %929 = vsyncadd [#allocation3], 4294966272 }
  0x11   :  { %930 = dma.done.wait [#allocation6], 640  }
  0x12   :  { %931 = vsyncadd [#allocation6], 4294966656 }
  0x13   :  { %932 = dma.done.wait [#allocation9], 256  }
  0x14   :  { %933 = vsyncadd [#allocation9], 4294967040  ;;  %v103_v0 = vld [vmem:[#allocation7 + $0x18] sm:$0xff]  ;;  %v171_v1 = vld [vmem:[#allocation8 + $0x8] sm:$0xff]  ;;  %vm176_vm0 = vcmask 130048   ;;  %vm104_vm1 = vcmask 261120  }
  0x15   :  { %v102_v2 = vld [vmem:[#allocation7 + $0x10] sm:$0xff]  ;;  %729 = vmatpush.msra.mxu2 %v103_v0  ;;  %730 = vmatpush.msra.mxu3 %v103_v0  ;;  %v170_v3 = vld [vmem:[#allocation8] sm:$0xff]  ;;  %v99_v4 = vld [vmem:[#allocation5] sm:$0xff]  ;;  %vm299_vm2 = vcmask 1041409   ;;  %vm301_vm3 = vcmask 1042434   ;;  %vm303_vm4 = vcmask 1043459  }
  0x16   :  { %194 = vmatpush.msra.mxu1 %v171_v1  ;;  %141 = vmatpush.msra.mxu0 %v103_v0  ;;  %v101_v5 = vld [vmem:[#allocation7 + $0x8] sm:$0xff]  ;;  %v100_v6 = vld [vmem:[#allocation7] sm:$0xff]  ;;  %v1008_v9 = vld [vmem:[#allocation2] sm:$0xff]  ;;  %vm305_vm5 = vcmask 1044484   ;;  %vm307_vm6 = vcmask 1045509   ;;  %vm1278_vm7 = vcmask 1046534  }
  0x17   :  { %731 = vmatpush.msra.mxu2 %v102_v2  ;;  %732 = vmatpush.msra.mxu3 %v102_v2  ;;  %v1004_v7 = vld [vmem:[#allocation2 + $0x10] sm:$0xff]  ;;  %v1006_v8 = vld [vmem:[#allocation2 + $0x28] sm:$0xff]  ;;  %v1016_v10 = vld [vmem:[#allocation2 + $0x18] sm:$0xff]  ;;  %vm1277_vm8 = vcmask 1047559   ;;  %vm1276_vm9 = vcmask 64512   ;;  %s703_s30 = sshll.u32 %s1275_s8, 4  ;;  %s704_s30 = int_to_ptr.hbm [resolvable:$true] %s703_s30 }
  0x18   :  { %195 = vmatpush.msra.mxu1 %v170_v3  ;;  %142 = vmatpush.msra.mxu0 %v102_v2  ;;  %v1018_v11 = vld [vmem:[#allocation2 + $0x30] sm:$0xff]  ;;  %v1020_v12 = vld [vmem:[#allocation2 + $0x8] sm:$0xff]  ;;  %v1028_v13 = vld [vmem:[#allocation2 + $0x20] sm:$0xff]  ;;  %s946_s8 = smov [#allocation10]   ;;  %s692_s12 = sshll.u32 %s1274_s7, 4  ;;  %s693_s12 = int_to_ptr.hbm [resolvable:$true] %s692_s12 }
  0x19   :  { %728 = vmatmul.msk.f32.vlgmr.msra.gmra.mxu1 %vm176_vm0, %v99_v4  ;;  %733 = vmatpush.msra.mxu2 %v101_v5  ;;  %v1030_v14 = vld [vmem:[#allocation2 + $0x38] sm:$0xff]  ;;  %v749_v15 = vld [vmem:[%s1270_s3] ss:$0 sm:$0xff]  ;;  %s945_s3 = smov [#allocation11]   ;;  %s690_s9 = sshll.u32 %s946_s8, 4  ;;  %s691_s9 = int_to_ptr.vmem [resolvable:$true] %s690_s9 }
  0x1a   :  { %734 = vmatpush.msra.mxu3 %v101_v5  ;;  %143 = vmatpush.msra.mxu0 %v101_v5  ;;  %v750_v16 = vld [vmem:[%s1272_s5] ss:$0 sm:$0xff]  ;;  %s701_s5 = sshll.u32 %s945_s3, 4  ;;  %s702_s5 = int_to_ptr.vmem [resolvable:$true] %s701_s5 }
  0x1b   :  { %735 = vmatpush.msra.mxu2 %v100_v6  ;;  %v751_v26 = vld [vmem:[%s1273_s6] ss:$0 sm:$0xff] }
  0x1c   :  { %736 = vmatpush.msra.mxu3 %v100_v6  ;;  %722 = vmatmul.msk.f32.vlgmr.msra.gmra.mxu2 %vm104_vm1, %v1004_v7 }
  0x1d   :  { %725 = vmatmul.msk.f32.vlgmr.msra.gmra.mxu3 %vm104_vm1, %v1006_v8  ;;  %144 = vmatpush.msra.mxu0 %v100_v6 }
  0x1e   :  { %720 = vmatmul.msk.f32.vlgmr.msra.gmra.mxu0 %vm104_vm1, %v1008_v9 }
  0x24   :  { %723 = vmatmul.msk.f32.gmra.mxu2 %vm104_vm1, %v1016_v10 }
  0x25   :  { %726 = vmatmul.msk.f32.gmra.mxu3 %vm104_vm1, %v1018_v11 }
  0x26   :  { %721 = vmatmul.msk.f32.gmra.mxu0 %vm104_vm1, %v1020_v12 }
  0x2c   :  { %724 = vmatmul.msk.f32.gmra.mxu2 %vm104_vm1, %v1028_v13 }
  0x2d   :  { %727 = vmatmul.msk.f32.gmra.mxu3 %vm104_vm1, %v1030_v14 }
  0x96   :  { %v197_v17 = vpop.f32.mrf.mxu1 }
  0x97   :  { %v198_v18 = vadd.f32 %v749_v15, %v197_v17 }
  0x99   :  { %v204_v19 = vadd.f32 %v750_v16, %v198_v18 }
  0x9b   :  { %v146_v20 = vpop.f32.mrf.mxu0  ;;  %v213_v21 = vperm.slane %v204_v19, 0  ;;  %v207_v22 = vrot.slane %v204_v19, 2  ;;  %v206_v23 = vrot.slane %v204_v19, 1  ;;  %v208_v32 = vrot.slane %v204_v19, 3 }
  0x9c   :  { %v211_v34 = vrot.slane %v204_v19, 6  ;;  %v210_v49 = vrot.slane %v204_v19, 5  ;;  %v209_v52 = vrot.slane %v204_v19, 4  ;;  %v212_v54 = vrot.slane %v204_v19, 7 }
  0x9d   :  { %v229_v24 = vadd.f32 %v213_v21, %v146_v20  ;;  %v215_v25 = vperm.slane %v207_v22, 0  ;;  %v214_v31 = vperm.slane %v206_v23, 0  ;;  %v216_v40 = vperm.slane %v208_v32, 0 }
  0x9e   :  { %v219_v41 = vperm.slane %v211_v34, 0  ;;  %v218_v56 = vperm.slane %v210_v49, 0  ;;  %v217_v58 = vperm.slane %v209_v52, 0  ;;  %v220_v59 = vperm.slane %v212_v54, 0 }
  0x9f   :  { %v237_v27 = vmax.f32 %v229_v24, 0.0  ;;  %v152_v28 = vpop.f32.mrf.mxu2  ;;  %v289_v22 = vlaneseq }
  0xa0   :  { %v231_v29 = vadd.f32 %v215_v25, %v152_v28  ;;  %v161_v30 = vpop.f32.mrf.mxu3 }
  0xa1   :  { %v249_v33 = vmul.f32 %v751_v26, %v237_v27  ;;  %v234_v1 = vadd.f32 %v218_v56, %v161_v30  ;;  %v1053_v25 = vand.u32 127, %v289_v22 }
  0xa2   :  { %v239_v35 = vmax.f32 %v231_v29, 0.0 }
  0xa3   :  { %v257_v36 = vsel %vm104_vm1, %v249_v33, 0.0  ;;  %v149_v37 = vpop.f32.mrf.mxu0  ;;  %v242_v15 = vmax.f32 %v234_v1, 0.0 }
  0xa4   :  { %258 = vadd.xlane.f32.xlu0 %v257_v36  ;;  %v230_v38 = vadd.f32 %v214_v31, %v149_v37  ;;  %v251_v39 = vmul.f32 %v751_v26, %v239_v35 }
  0xa5   :  { %v254_v18 = vmul.f32 %v751_v26, %v242_v15 }
  0xa6   :  { %v238_v42 = vmax.f32 %v230_v38, 0.0  ;;  %v263_v43 = vsel %vm104_vm1, %v251_v39, 0.0 }
  0xa7   :  { %264 = vadd.xlane.f32.xlu1 %v263_v43  ;;  %v155_v44 = vpop.f32.mrf.mxu2  ;;  %v272_v19 = vsel %vm104_vm1, %v254_v18, 0.0 }
  0xa8   :  { %v164_v45 = vpop.f32.mrf.mxu3  ;;  %v232_v46 = vadd.f32 %v216_v40, %v155_v44  ;;  %v250_v47 = vmul.f32 %v751_v26, %v238_v42 }
  0xa9   :  { %v235_v48 = vadd.f32 %v219_v41, %v164_v45 }
  0xaa   :  { %v240_v50 = vmax.f32 %v232_v46, 0.0  ;;  %v260_v51 = vsel %vm104_vm1, %v250_v47, 0.0  ;;  %v944_v46 = vmov 0  }
  0xab   :  { %v243_v53 = vmax.f32 %v235_v48, 0.0  ;;  %748 = vset.pattern.permute.xlu2 %v944_v46  ;;  %747 = vset.pattern.permute.xlu1 %v944_v46 }
  0xac   :  { %261 = vadd.xlane.f32.xlu0 %v260_v51  ;;  %v252_v55 = vmul.f32 %v751_v26, %v240_v50 }
  0xad   :  { %v255_v61 = vmul.f32 %v751_v26, %v243_v53  ;;  %746 = vset.pattern.permute.xlu0 %v944_v46 }
  0xae   :  { %v266_v57 = vsel %vm104_vm1, %v252_v55, 0.0 }
  0xaf   :  { %267 = vadd.xlane.f32.xlu1 %v266_v57  ;;  %v158_v60 = vpop.f32.mrf.mxu2  ;;  %v275_v4 = vsel %vm104_vm1, %v255_v61, 0.0 }
  0xb0   :  { %v167_v62 = vpop.f32.mrf.mxu3  ;;  %v233_v63 = vadd.f32 %v217_v58, %v158_v60 }
  0xb1   :  { %v236_v0 = vadd.f32 %v220_v59, %v167_v62 }
  0xb2   :  { %v241_v2 = vmax.f32 %v233_v63, 0.0 }
  0xb3   :  { %v244_v3 = vmax.f32 %v236_v0, 0.0 }
  0xb4   :  { %276 = vadd.xlane.f32.xlu0 %v275_v4  ;;  %v253_v5 = vmul.f32 %v751_v26, %v241_v2 }
  0xb5   :  { %v256_v6 = vmul.f32 %v751_v26, %v244_v3 }
  0xb6   :  { %v269_v16 = vsel %vm104_vm1, %v253_v5, 0.0 }
  0xb7   :  { %v278_v17 = vsel %vm104_vm1, %v256_v6, 0.0  ;;  %270 = vadd.xlane.f32.xlu2 %v269_v16 }
  0xb8   :  { %279 = vadd.xlane.f32.xlu1 %v278_v17 }
  0xbf   :  { %273 = vadd.xlane.f32.xlu2 %v272_v19 }
 0x117   :  { %v259_v20 = vpop.xlane.xlu0 %258 }
 0x118   :  { %v291_v28 = vperm.slane %v259_v20, %v1053_v25 }
 0x11a   :  { %v265_v21 = vpop.xlane.xlu1 %264 }
 0x11b   :  { %v293_v31 = vperm.slane %v265_v21, %v1053_v25 }
 0x11f   :  { %v262_v23 = vpop.xlane.xlu0 %261 }
 0x120   :  { %v292_v29 = vperm.slane %v262_v23, %v1053_v25 }
 0x122   :  { %v268_v24 = vpop.xlane.xlu1 %267  ;;  %v300_v30 = vsel %vm299_vm2, %v292_v29, %v291_v28 }
 0x123   :  { %v294_v26 = vperm.slane %v268_v24, %v1053_v25  ;;  %v302_v34 = vsel %vm301_vm3, %v293_v31, %v300_v30 }
 0x125   :  { %v304_v37 = vsel %vm303_vm4, %v294_v26, %v302_v34 }
 0x127   :  { %v277_v33 = vpop.xlane.xlu0 %276 }
 0x128   :  { %v297_v39 = vperm.slane %v277_v33, %v1053_v25 }
 0x12a   :  { %v271_v27 = vpop.xlane.xlu2 %270 }
 0x12b   :  { %v295_v32 = vperm.slane %v271_v27, %v1053_v25  ;;  %v280_v35 = vpop.xlane.xlu1 %279 }
 0x12c   :  { %v298_v41 = vperm.slane %v280_v35, %v1053_v25 }
 0x12d   :  { %v306_v40 = vsel %vm305_vm5, %v295_v32, %v304_v37 }
 0x132   :  { %v274_v36 = vpop.xlane.xlu2 %273 }
 0x133   :  { %v296_v38 = vperm.slane %v274_v36, %v1053_v25 }
 0x135   :  { %v308_v42 = vsel %vm307_vm6, %v296_v38, %v306_v40 }
 0x136   :  { %v310_v43 = vsel %vm1278_vm7, %v297_v39, %v308_v42 }
 0x137   :  { %v312_v44 = vsel %vm1277_vm8, %v298_v41, %v310_v43 }
 0x138   :  { %v315_v45 = vsel %vm1276_vm9, %v312_v44, -inf }
 0x139   :  { %316 = vmax.xlane.f32.xlu2 %v315_v45 }
 0x1ac   :  { %v317_v47 = vpop.xlane.xlu2 %316 }
 0x1ad   :  { %v321_v48 = vperm.slane %v317_v47, 2  ;;  %v320_v49 = vperm.slane %v317_v47, 1  ;;  %v319_v50 = vperm.slane %v317_v47, 0  ;;  %v322_v54 = vperm.slane %v317_v47, 3 }
 0x1ae   :  { %v323_v55 = vperm.slane %v317_v47, 4  ;;  %v326_v56 = vperm.slane %v317_v47, 7  ;;  %v324_v0 = vperm.slane %v317_v47, 5  ;;  %v325_v2 = vperm.slane %v317_v47, 6 }
 0x1af   :  { %v337_v51 = vsub.f32 %v265_v21, %v321_v48  ;;  %v336_v52 = vsub.f32 %v262_v23, %v320_v49  ;;  %v335_v53 = vsub.f32 %v259_v20, %v319_v50  ;;  %v338_v60 = vsub.f32 %v268_v24, %v322_v54 }
 0x1b0   :  { %v339_v61 = vsub.f32 %v271_v27, %v323_v55  ;;  %v342_v62 = vsub.f32 %v280_v35, %v326_v56  ;;  %v340_v15 = vsub.f32 %v274_v36, %v324_v0  ;;  %v341_v16 = vsub.f32 %v277_v33, %v325_v2 }
 0x1b1   :  { %v347_v57 = vmul.f32 1.442695, %v337_v51  ;;  %v345_v58 = vmul.f32 1.442695, %v336_v52  ;;  %v343_v59 = vmul.f32 1.442695, %v335_v53 }
 0x1b2   :  { %v349_v63 = vmul.f32 1.442695, %v338_v60  ;;  %v351_v1 = vmul.f32 1.442695, %v339_v61  ;;  %v357_v4 = vmul.f32 1.442695, %v342_v62 }
 0x1b3   :  { %752 = vpow2.f32 %v347_v57  ;;  %v353_v17 = vmul.f32 1.442695, %v340_v15  ;;  %v355_v18 = vmul.f32 1.442695, %v341_v16 }
 0x1b4   :  { %754 = vpow2.f32 %v345_v58 }
 0x1b5   :  { %756 = vpow2.f32 %v343_v59 }
 0x1b6   :  { %758 = vpow2.f32 %v349_v63 }
 0x1b7   :  { %760 = vpow2.f32 %v351_v1 }
 0x1b8   :  { %762 = vpow2.f32 %v357_v4 }
 0x1b9   :  { %v1071_v3 = vpop.eup %752  ;;  %764 = vpow2.f32 %v353_v17 }
 0x1ba   :  { %v1073_v5 = vpop.eup %754  ;;  %374 = vperm.xlu2 %748, %v1071_v3   ;;  %766 = vpow2.f32 %v355_v18 }
 0x1bb   :  { %v1076_v6 = vpop.eup %756  ;;  %371 = vperm.xlu1 %747, %v1073_v5  }
 0x1bc   :  { %368 = vperm.xlu0 %746, %v1076_v6   ;;  %v1080_v19 = vpop.eup %758 }
 0x1bd   :  { %v1082_v20 = vpop.eup %760 }
 0x1be   :  { %v1085_v21 = vpop.eup %762 }
 0x1bf   :  { %v1089_v22 = vpop.eup %764 }
 0x1c0   :  { %v1091_v23 = vpop.eup %766 }
 0x1c2   :  { %377 = vperm.xlu2 %748, %v1080_v19  }
 0x1c3   :  { %380 = vperm.xlu1 %747, %v1082_v20  }
 0x1c4   :  { %389 = vperm.xlu0 %746, %v1085_v21  }
 0x1ca   :  { %383 = vperm.xlu2 %748, %v1089_v22  }
 0x1cb   :  { %386 = vperm.xlu1 %747, %v1091_v23  }
 0x214   :  { %v375_v24 = vpop.permute.xlu2 %374 }
 0x215   :  { %v393_v33 = vperm.slane %v375_v24, %v1053_v25 }
 0x21c   :  { %v378_v29 = vpop.permute.xlu2 %377 }
 0x21d   :  { %v394_v36 = vperm.slane %v378_v29, %v1053_v25 }
 0x224   :  { %v384_v37 = vpop.permute.xlu2 %383 }
 0x225   :  { %v396_v41 = vperm.slane %v384_v37, %v1053_v25 }
 0x22d   :  { %v372_v27 = vpop.permute.xlu1 %371 }
 0x22e   :  { %v369_v28 = vpop.permute.xlu0 %368  ;;  %v392_v30 = vperm.slane %v372_v27, %v1053_v25 }
 0x22f   :  { %v391_v26 = vperm.slane %v369_v28, %v1053_v25 }
 0x231   :  { %v399_v31 = vsel %vm299_vm2, %v392_v30, %v391_v26 }
 0x232   :  { %v400_v34 = vsel %vm301_vm3, %v393_v33, %v399_v31 }
 0x233   :  { %v401_v38 = vsel %vm303_vm4, %v394_v36, %v400_v34 }
 0x235   :  { %v381_v32 = vpop.permute.xlu1 %380 }
 0x236   :  { %v395_v35 = vperm.slane %v381_v32, %v1053_v25  ;;  %v390_v40 = vpop.permute.xlu0 %389 }
 0x237   :  { %v398_v44 = vperm.slane %v390_v40, %v1053_v25 }
 0x238   :  { %v402_v39 = vsel %vm305_vm5, %v395_v35, %v401_v38 }
 0x239   :  { %v403_v45 = vsel %vm307_vm6, %v396_v41, %v402_v39 }
 0x23d   :  { %v387_v42 = vpop.permute.xlu1 %386 }
 0x23e   :  { %v397_v43 = vperm.slane %v387_v42, %v1053_v25 }
 0x240   :  { %v404_v46 = vsel %vm1278_vm7, %v397_v43, %v403_v45 }
 0x241   :  { %v405_v47 = vsel %vm1277_vm8, %v398_v44, %v404_v46 }
 0x242   :  { %v407_v48 = vsel %vm1276_vm9, %v405_v47, 0.0 }
 0x243   :  { %408 = vadd.xlane.f32.xlu2 %v407_v48 }
 0x2b6   :  { %v409_v49 = vpop.xlane.xlu2 %408 }
 0x2b7   :  { %v411_v50 = vperm.slane %v409_v49, 0  ;;  %v412_v51 = vperm.slane %v409_v49, 1  ;;  %v1111_v52 = vperm.slane %v409_v49, 2  ;;  %v1113_v53 = vperm.slane %v409_v49, 3 }
 0x2b8   :  { %v1115_v54 = vperm.slane %v409_v49, 4  ;;  %v1117_v55 = vperm.slane %v409_v49, 5  ;;  %v1123_v60 = vperm.slane %v409_v49, 7  ;;  %v1125_v63 = vperm.slane %v409_v49, 6 }
 0x2b9   :  { %768 = vrcp.f32 %v411_v50  ;;  %v451_v56 = vand.u32 2147483647, %v412_v51  ;;  %v453_v57 = vand.u32 2147483648, %v412_v51  ;;  %v436_v58 = vand.u32 2147483647, %v411_v50 }
 0x2ba   :  { %770 = vrcp.f32 %v412_v51  ;;  %v438_v61 = vand.u32 2147483648, %v411_v50  ;;  %vm447_vm10 = vweird.f32 %v412_v51  ;;  %vm432_vm12 = vweird.f32 %v411_v50 }
 0x2bb   :  { %772 = vrcp.f32 %v1111_v52  ;;  %vm1129_vm11 = vcmp.eq.f32.partialorder %v451_v56, 8.507059e+37  ;;  %v454_v16 = vor.u32 1.1754944e-38, %v453_v57  ;;  %vm1135_vm13 = vcmp.eq.f32.partialorder %v436_v58, 8.507059e+37 }
 0x2bc   :  { %774 = vrcp.f32 %v1113_v53  ;;  %v439_v29 = vor.u32 1.1754944e-38, %v438_v61  ;;  %v483_v38 = vand.u32 2147483648, %v1113_v53  ;;  %v468_v40 = vand.u32 2147483648, %v1111_v52 }
 0x2bd   :  { %776 = vrcp.f32 %v1115_v54  ;;  %v466_v57 = vand.u32 2147483647, %v1111_v52 }
 0x2be   :  { %778 = vrcp.f32 %v1117_v55 }
 0x2bf   :  { %v769_v59 = vpop.eup %768  ;;  %780 = vrcp.f32 %v1123_v60 }
 0x2c0   :  { %v771_v62 = vpop.eup %770  ;;  %v428_v0 = vmul.f32 %v769_v59, %v411_v50  ;;  %vm433_vm14 = vweird.f32 %v769_v59  ;;  %782 = vrcp.f32 %v1125_v63 }
 0x2c1   :  { %v1127_v1 = vpop.eup %772  ;;  %v443_v2 = vmul.f32 %v771_v62, %v412_v51  ;;  %vm448_vm15 = vweird.f32 %v771_v62  ;;  %vm434_vm0 = vmor %vm432_vm12, %vm433_vm14  ;;  %vm477_vm12 = vweird.f32 %v1113_v53 }
 0x2c2   :  { %v1133_v15 = vpop.eup %774  ;;  %v429_v17 = vsub.f32 1.0, %v428_v0  ;;  %v458_v24 = vmul.f32 %v1127_v1, %v1111_v52  ;;  %vm463_vm9 = vweird.f32 %v1127_v1  ;;  %vm449_vm8 = vmor %vm447_vm10, %vm448_vm15  ;;  %vm462_vm10 = vweird.f32 %v1111_v52 }
 0x2c3   :  { %v1141_v27 = vpop.eup %776  ;;  %v444_v28 = vsub.f32 1.0, %v443_v2  ;;  %v473_v30 = vmul.f32 %v1133_v15, %v1113_v53  ;;  %vm478_vm7 = vweird.f32 %v1133_v15  ;;  %v469_v52 = vor.u32 1.1754944e-38, %v468_v40 }
 0x2c4   :  { %v1146_v26 = vpop.eup %778  ;;  %v430_v31 = vmul.f32 %v769_v59, %v429_v17  ;;  %v459_v32 = vsub.f32 1.0, %v458_v24  ;;  %v488_v33 = vmul.f32 %v1141_v27, %v1115_v54  ;;  %v484_v2 = vor.u32 1.1754944e-38, %v483_v38 }
 0x2c5   :  { %v445_v34 = vmul.f32 %v771_v62, %v444_v28  ;;  %v474_v35 = vsub.f32 1.0, %v473_v30  ;;  %v503_v36 = vmul.f32 %v1146_v26, %v1117_v55  ;;  %v1162_v46 = vpop.eup %780  ;;  %vm508_vm14 = vweird.f32 %v1146_v26 }
 0x2c6   :  { %v431_v37 = vadd.f32 %v769_v59, %v430_v31  ;;  %v460_v39 = vmul.f32 %v1127_v1, %v459_v32  ;;  %v489_v45 = vsub.f32 1.0, %v488_v33  ;;  %v498_v24 = vand.u32 2147483648, %v1115_v54 }
 0x2c7   :  { %v446_v41 = vadd.f32 %v771_v62, %v445_v34  ;;  %v475_v42 = vmul.f32 %v1133_v15, %v474_v35  ;;  %v504_v50 = vsub.f32 1.0, %v503_v36  ;;  %vm492_vm15 = vweird.f32 %v1115_v54 }
 0x2c8   :  { %v435_v43 = vsel %vm434_vm0, %v769_v59, %v431_v37  ;;  %v461_v44 = vadd.f32 %v1127_v1, %v460_v39  ;;  %v481_v59 = vand.u32 2147483647, %v1113_v53  ;;  %v533_v53 = vmul.f32 %v1162_v46, %v1123_v60 }
 0x2c9   :  { %v450_v47 = vsel %vm449_vm8, %v771_v62, %v446_v41  ;;  %v440_v48 = vsel %vm1135_vm13, %v439_v29, %v435_v43  ;;  %v476_v49 = vadd.f32 %v1133_v15, %v475_v42  ;;  %vm464_vm8 = vmor %vm462_vm10, %vm463_vm9  ;;  %v1181_v62 = vpop.eup %782  ;;  %v505_v0 = vmul.f32 %v1146_v26, %v504_v50 }
 0x2ca   :  { %v455_v56 = vsel %vm1129_vm11, %v454_v16, %v450_v47  ;;  %v441_v51 = vmul.f32 %v1076_v6, %v440_v48  ;;  %vm479_vm13 = vmor %vm477_vm12, %vm478_vm7  ;;  %v465_v61 = vsel %vm464_vm8, %v1127_v1, %v461_v44  ;;  %v490_v6 = vmul.f32 %v1141_v27, %v489_v45 }
 0x2cb   :  { %v456_v58 = vmul.f32 %v1073_v5, %v455_v56  ;;  %v480_v5 = vsel %vm479_vm13, %v1133_v15, %v476_v49  ;;  %vm467_vm9 = vcmp.eq.f32.partialorder %v466_v57, 8.507059e+37  ;;  %vm482_vm11 = vcmp.eq.f32.partialorder %v481_v59, 8.507059e+37 }
 0x2cc   :  { %549 = vperm.xlu1 %747, %v441_v51   ;;  %v470_v4 = vsel %vm467_vm9, %v469_v52, %v465_v61  ;;  %v513_v16 = vand.u32 2147483648, %v1117_v55  ;;  %v485_v1 = vsel %vm482_vm11, %v484_v2, %v480_v5  ;;  %v491_v17 = vadd.f32 %v1141_v27, %v490_v6 }
 0x2cd   :  { %554 = vperm.xlu0 %746, %v456_v58   ;;  %vm493_vm7 = vweird.f32 %v1141_v27  ;;  %v518_v15 = vmul.f32 %v1181_v62, %v1125_v63  ;;  %v506_v18 = vadd.f32 %v1146_v26, %v505_v0  ;;  %v534_v28 = vsub.f32 1.0, %v533_v53 }
 0x2ce   :  { %v471_v29 = vmul.f32 %v1071_v3, %v470_v4  ;;  %v496_v30 = vand.u32 2147483647, %v1115_v54  ;;  %v486_v32 = vmul.f32 %v1080_v19, %v485_v1  ;;  %vm507_vm0 = vweird.f32 %v1117_v55  ;;  %vm494_vm10 = vmor %vm492_vm15, %vm493_vm7 }
 0x2cf   :  { %v519_v31 = vsub.f32 1.0, %v518_v15  ;;  %v511_v33 = vand.u32 2147483647, %v1117_v55  ;;  %vm509_vm12 = vmor %vm507_vm0, %vm508_vm14  ;;  %v495_v34 = vsel %vm494_vm10, %v1141_v27, %v491_v17  ;;  %v499_v36 = vor.u32 1.1754944e-38, %v498_v24 }
 0x2d0   :  { %v510_v3 = vsel %vm509_vm12, %v1146_v26, %v506_v18  ;;  %v535_v54 = vmul.f32 %v1162_v46, %v534_v28  ;;  %v514_v37 = vor.u32 1.1754944e-38, %v513_v16  ;;  %vm497_vm8 = vcmp.eq.f32.partialorder %v496_v30, 8.507059e+37 }
 0x2d1   :  { %v520_v35 = vmul.f32 %v1181_v62, %v519_v31  ;;  %vm512_vm13 = vcmp.eq.f32.partialorder %v511_v33, 8.507059e+37  ;;  %v500_v19 = vsel %vm497_vm8, %v499_v36, %v495_v34  ;;  %vm523_vm9 = vweird.f32 %v1181_v62 }
 0x2d2   :  { %v515_v38 = vsel %vm512_vm13, %v514_v37, %v510_v3  ;;  %v536_v39 = vadd.f32 %v1162_v46, %v535_v54  ;;  %vm538_vm11 = vweird.f32 %v1162_v46  ;;  %v528_v27 = vand.u32 2147483648, %v1125_v63 }
 0x2d3   :  { %v521_v55 = vadd.f32 %v1181_v62, %v520_v35  ;;  %v501_v26 = vmul.f32 %v1082_v20, %v500_v19  ;;  %v543_v40 = vand.u32 2147483648, %v1123_v60  ;;  %vm522_vm7 = vweird.f32 %v1125_v63 }
 0x2d4   :  { %559 = vperm.xlu1 %747, %v471_v29   ;;  %v526_v41 = vand.u32 2147483647, %v1125_v63  ;;  %v516_v42 = vmul.f32 %v1089_v22, %v515_v38  ;;  %vm537_vm14 = vweird.f32 %v1123_v60  ;;  %v541_v43 = vand.u32 2147483647, %v1123_v60  ;;  %vm524_vm15 = vmor %vm522_vm7, %vm523_vm9 }
 0x2d5   :  { %564 = vperm.xlu0 %746, %v486_v32   ;;  %vm539_vm0 = vmor %vm537_vm14, %vm538_vm11  ;;  %v525_v44 = vsel %vm524_vm15, %v1181_v62, %v521_v55  ;;  %v529_v45 = vor.u32 1.1754944e-38, %v528_v27  ;;  %v544_v47 = vor.u32 1.1754944e-38, %v543_v40  ;;  %vm1283_vm8 = vcmask 1046534  }
 0x2d6   :  { %v540_v20 = vsel %vm539_vm0, %v1162_v46, %v536_v39  ;;  %vm527_vm10 = vcmp.eq.f32.partialorder %v526_v41, 8.507059e+37  ;;  %vm542_vm12 = vcmp.eq.f32.partialorder %v541_v43, 8.507059e+37  ;;  %vm1284_vm13 = vcmask 1047559  }
 0x2d7   :  { %v530_v48 = vsel %vm527_vm10, %v529_v45, %v525_v44  ;;  %v545_v63 = vsel %vm542_vm12, %v544_v47, %v540_v20  ;;  %vm1285_vm9 = vcmask 64512  }
 0x2d8   :  { %v531_v22 = vmul.f32 %v1091_v23, %v530_v48  ;;  %v546_v49 = vmul.f32 %v1085_v21, %v545_v63 }
 0x2dc   :  { %569 = vperm.xlu1 %747, %v501_v26  }
 0x2dd   :  { %574 = vperm.xlu0 %746, %v516_v42  }
 0x2e4   :  { %579 = vperm.xlu1 %747, %v531_v22  }
 0x2e5   :  { %584 = vperm.xlu0 %746, %v546_v49  }
 0x33e   :  { %v550_v60 = vpop.permute.xlu1 %549 }
 0x33f   :  { %v555_v50 = vpop.permute.xlu0 %554  ;;  %v587_v56 = vmul.f32 %v550_v60, %v1008_v9  ;;  %v668_v4 = vperm.slane %v550_v60, %v1053_v25 }
 0x340   :  { %v588_v51 = vmul.f32 %v555_v50, %v1020_v12  ;;  %v669_v2 = vperm.slane %v555_v50, %v1053_v25 }
 0x341   :  { %v595_v46 = vsel %vm104_vm1, %v587_v56, 0.0 }
 0x342   :  { %v602_v57 = vsel %vm104_vm1, %v588_v51, 0.0  ;;  %v596_v58 = vrot.slane %v595_v46, 4  ;;  %v676_v28 = vsel %vm299_vm2, %v669_v2, %v668_v4 }
 0x343   :  { %v603_v59 = vrot.slane %v602_v57, 4 }
 0x344   :  { %v597_v6 = vadd.f32 %v596_v58, %v595_v46 }
 0x345   :  { %v604_v61 = vadd.f32 %v603_v59, %v602_v57 }
 0x346   :  { %v560_v62 = vpop.permute.xlu1 %559  ;;  %v598_v9 = vrot.slane %v597_v6, 2 }
 0x347   :  { %v565_v23 = vpop.permute.xlu0 %564  ;;  %v589_v21 = vmul.f32 %v560_v62, %v1004_v7  ;;  %v605_v0 = vrot.slane %v604_v61, 2  ;;  %v670_v17 = vperm.slane %v560_v62, %v1053_v25 }
 0x348   :  { %v590_v5 = vmul.f32 %v565_v23, %v1016_v10  ;;  %v599_v7 = vadd.f32 %v598_v9, %v597_v6  ;;  %v671_v29 = vperm.slane %v565_v23, %v1053_v25 }
 0x349   :  { %v609_v52 = vsel %vm104_vm1, %v589_v21, 0.0  ;;  %v606_v18 = vadd.f32 %v605_v0, %v604_v61  ;;  %v677_v33 = vsel %vm301_vm3, %v670_v17, %v676_v28 }
 0x34a   :  { %v616_v12 = vsel %vm104_vm1, %v590_v5, 0.0  ;;  %v610_v53 = vrot.slane %v609_v52, 4  ;;  %v600_v37 = vrot.slane %v599_v7, 1 }
 0x34b   :  { %v617_v16 = vrot.slane %v616_v12, 4  ;;  %v607_v54 = vrot.slane %v606_v18, 1 }
 0x34c   :  { %v611_v1 = vadd.f32 %v610_v53, %v609_v52  ;;  %v601_v43 = vadd.f32 %v600_v37, %v599_v7 }
 0x34d   :  { %v618_v15 = vadd.f32 %v617_v16, %v616_v12  ;;  %v608_v42 = vadd.f32 %v607_v54, %v606_v18 }
 0x34e   :  { %v612_v24 = vrot.slane %v611_v1, 2  ;;  %v570_v10 = vpop.permute.xlu1 %569 }
 0x34f   :  { %v575_v30 = vpop.permute.xlu0 %574  ;;  %v591_v31 = vmul.f32 %v570_v10, %v1028_v13  ;;  %v619_v32 = vrot.slane %v618_v15, 2  ;;  %v672_v35 = vperm.slane %v570_v10, %v1053_v25  ;;  %v678_v13 = vsel %vm303_vm4, %v671_v29, %v677_v33 }
 0x350   :  { %v592_v34 = vmul.f32 %v575_v30, %v1006_v8  ;;  %v613_v3 = vadd.f32 %v612_v24, %v611_v1  ;;  %v673_v39 = vperm.slane %v575_v30, %v1053_v25 }
 0x351   :  { %v623_v36 = vsel %vm104_vm1, %v591_v31, 0.0  ;;  %v620_v27 = vadd.f32 %v619_v32, %v618_v15  ;;  %v679_v40 = vsel %vm305_vm5, %v672_v35, %v678_v13 }
 0x352   :  { %v630_v19 = vsel %vm104_vm1, %v592_v34, 0.0  ;;  %v624_v38 = vrot.slane %v623_v36, 4  ;;  %v614_v8 = vrot.slane %v613_v3, 1  ;;  %v680_v48 = vsel %vm307_vm6, %v673_v39, %v679_v40 }
 0x353   :  { %v631_v55 = vrot.slane %v630_v19, 4  ;;  %v621_v49 = vrot.slane %v620_v27, 1 }
 0x354   :  { %v625_v26 = vadd.f32 %v624_v38, %v623_v36  ;;  %v615_v51 = vadd.f32 %v614_v8, %v613_v3 }
 0x355   :  { %v632_v41 = vadd.f32 %v631_v55, %v630_v19  ;;  %v622_v23 = vadd.f32 %v621_v49, %v620_v27 }
 0x356   :  { %v626_v44 = vrot.slane %v625_v26, 2  ;;  %v580_v20 = vpop.permute.xlu1 %579 }
 0x357   :  { %v633_v45 = vrot.slane %v632_v41, 2  ;;  %v585_v47 = vpop.permute.xlu0 %584  ;;  %v593_v63 = vmul.f32 %v580_v20, %v1018_v11  ;;  %v674_v22 = vperm.slane %v580_v20, %v1053_v25 }
 0x358   :  { %v627_v60 = vadd.f32 %v626_v44, %v625_v26  ;;  %v594_v50 = vmul.f32 %v585_v47, %v1030_v14  ;;  %v675_v56 = vperm.slane %v585_v47, %v1053_v25  ;;  %v659_v25 = vsel %vm299_vm2, %v608_v42, %v601_v43  ;;  %vm1286_vm2 = vmmov %vm1283_vm8 }
 0x359   :  { %v634_v46 = vadd.f32 %v633_v45, %v632_v41  ;;  %v637_v57 = vsel %vm104_vm1, %v593_v63, 0.0  ;;  %v681_v58 = vsel %vm1283_vm8, %v674_v22, %v680_v48  ;;  %v660_v52 = vsel %vm301_vm3, %v615_v51, %v659_v25  ;;  %vm1287_vm3 = vmmov %vm1284_vm13 }
 0x35a   :  { %v628_v59 = vrot.slane %v627_v60, 1  ;;  %v644_v61 = vsel %vm104_vm1, %v594_v50, 0.0  ;;  %v638_v11 = vrot.slane %v637_v57, 4  ;;  %v682_v6 = vsel %vm1284_vm13, %v675_v56, %v681_v58 }
 0x35b   :  { %v645_v62 = vrot.slane %v644_v61, 4  ;;  %684 = vst.msk [vmem:[#allocation11] sm:$0xff] %vm1285_vm9, %v682_v6  ;;  %v635_v21 = vrot.slane %v634_v46, 1  ;;  %v661_v16 = vsel %vm303_vm4, %v622_v23, %v660_v52 }
 0x35c   :  { %v639_v14 = vadd.f32 %v638_v11, %v637_v57  ;;  %706 = dma.vmem_to_hbm [thread:$0]  %s702_s5, 128, %s704_s30, [#allocation12]   ;;  %v629_v0 = vadd.f32 %v628_v59, %v627_v60 }
 0x35d   :  { %v646_v5 = vadd.f32 %v645_v62, %v644_v61  ;;  %v636_v2 = vadd.f32 %v635_v21, %v634_v46 }
 0x35e   :  { %v640_v9 = vrot.slane %v639_v14, 2  ;;  %v662_v17 = vsel %vm305_vm5, %v629_v0, %v661_v16 }
 0x35f   :  { %v647_v12 = vrot.slane %v646_v5, 2  ;;  %v663_v24 = vsel %vm307_vm6, %v636_v2, %v662_v17 }
 0x360   :  { %v641_v53 = vadd.f32 %v640_v9, %v639_v14 }
 0x361   :  { %v648_v4 = vadd.f32 %v647_v12, %v646_v5 }
 0x362   :  { %v642_v1 = vrot.slane %v641_v53, 1 }
 0x363   :  { %v649_v15 = vrot.slane %v648_v4, 1 }
 0x364   :  { %v643_v18 = vadd.f32 %v642_v1, %v641_v53 }
 0x365   :  { %v650_v7 = vadd.f32 %v649_v15, %v648_v4 }
 0x366   :  { %v664_v10 = vsel %vm1286_vm2, %v643_v18, %v663_v24 }
 0x367   :  { %v665_v28 = vsel %vm1287_vm3, %v650_v7, %v664_v10 }
 0x368   :  { %667 = vst.msk [vmem:[#allocation10] sm:$0xff] %vm104_vm1, %v665_v28 }
 0x369   :  { %695 = dma.vmem_to_hbm [thread:$0]  %s691_s9, 128, %s693_s12, [#allocation4]  }
 0x36a   :  { %934 = dma.done.wait [#allocation4], 128  }
 0x36b   :  { %935 = vsyncadd [#allocation4], 4294967168 }
 0x36c   :  { %936 = dma.done.wait [#allocation12], 128  }
 0x36d   :  { %937 = vsyncadd [#allocation12], 4294967168 }
 0x36e   :  { %715 = vsyncpa [#allocation3], 1 }
 0x36f   :  { %716 = vsyncpa [#allocation6], 1 }
 0x370   :  { %717 = vsyncpa [#allocation9], 1 }
 0x371   :  { %718 = vsyncpa [#allocation4], 1 }
 0x372   :  { %719 = vsyncpa [#allocation12], 1 }

// kernel: tpu_custom_call.1
= control target key start
LH: loop header
LB: loop body
LE: loop exit
PB: predicated region body
PF: predicated region fallthrough
CT: control target
= control target key end

     0   :  { %14 = vsyncpa [#allocation3], 0  ;;  %s1267_s0 = inlined_call_operand.hbm [shape: f32[8,8,32], index: 0, kind: input, shape index: {}]   ;;  %s1268_s1 = inlined_call_operand.hbm [shape: f32[8,16], index: 1, kind: input, shape index: {}]   ;;  %s1269_s2 = inlined_call_operand.hbm [shape: f32[32,32], index: 2, kind: input, shape index: {}]   ;;  %s1270_s3 = inlined_call_operand.vmem [shape: f32[1,32], index: 3, kind: input, shape index: {}]   ;;  %s1271_s4 = inlined_call_operand.hbm [shape: f32[16,32], index: 4, kind: input, shape index: {}]   ;;  %s1272_s5 = inlined_call_operand.vmem [shape: f32[1,32], index: 5, kind: input, shape index: {}]   ;;  %s1273_s6 = inlined_call_operand.vmem [shape: f32[1,32], index: 6, kind: input, shape index: {}]   ;;  %s1274_s7 = inlined_call_operand.hbm [shape: f32[8,32], index: 7, kind: output, shape index: {0}]   ;;  %s1275_s8 = inlined_call_operand.hbm [shape: f32[8,8], index: 8, kind: output, shape index: {1}]  }
   0x1   :  { %15 = vsyncpa [#allocation6], 0 }
   0x2   :  { %16 = vsyncpa [#allocation9], 0 }
   0x3   :  { %17 = vsyncpa [#allocation4], 0  ;;  %s37_s29 = sshll.u32 %s1268_s1, 4  ;;  %s38_s29 = int_to_ptr.hbm [resolvable:$true] %s37_s29 }
   0x4   :  { %18 = vsyncpa [#allocation12], 0  ;;  %s938_s30 = smov [#allocation5]   ;;  %s23_s12 = sshll.u32 %s1267_s0, 4  ;;  %s24_s12 = int_to_ptr.hbm [resolvable:$true] %s23_s12 }
   0x5   :  { %s39_s9 = sshll.u32 %s938_s30, 4  ;;  %s939_s13 = smov [#allocation2]   ;;  %s40_s9 = int_to_ptr.vmem [resolvable:$true] %s39_s9 }
   0x6   :  { %42 = dma.hbm_to_vmem [thread:$0]  %s38_s29, 128, %s40_s9, [#allocation6]  }
   0x7   :  { %s25_s14 = sshll.u32 %s939_s13, 4  ;;  %s940_s15 = smov 128   ;;  %s26_s14 = int_to_ptr.vmem [resolvable:$true] %s25_s14 }
   0x8   :  { %s941_s16 = smov 8   ;;  %s47_s1 = sshll.u32 %s1269_s2, 4  ;;  %s48_s1 = int_to_ptr.hbm [resolvable:$true] %s47_s1 }
   0x9   :  { %31 = dma.hbm_to_vmem [thread:$0]  %s24_s12, 1024, %s26_s14, [#allocation3], %s940_s15, %s940_s15, %s941_s16  }
   0xa   :  { %s942_s19 = smov [#allocation7]   ;;  %s62_s0 = sshll.u32 %s1271_s4, 4  ;;  %s63_s0 = int_to_ptr.hbm [resolvable:$true] %s62_s0 }
   0xb   :  { %s49_s20 = sshll.u32 %s942_s19, 4  ;;  %s943_s23 = smov [#allocation8]   ;;  %s50_s20 = int_to_ptr.vmem [resolvable:$true] %s49_s20 }
   0xc   :  { %55 = dma.hbm_to_vmem [thread:$0]  %s48_s1, 512, %s50_s20, [#allocation6], %s940_s15, %s940_s15, %s941_s16  }
   0xd   :  { %s64_s24 = sshll.u32 %s943_s23, 4  ;;  %s65_s24 = int_to_ptr.vmem [resolvable:$true] %s64_s24 }
   0xe   :  { %70 = dma.hbm_to_vmem [thread:$0]  %s63_s0, 256, %s65_s24, [#allocation9], %s940_s15, %s940_s15, %s941_s16  }
   0xf   :  { %928 = dma.done.wait [#allocation3], 1024  }
  0x10   :  { %929 = vsyncadd [#allocation3], 4294966272 }
  0x11   :  { %930 = dma.done.wait [#allocation6], 640  }
  0x12   :  { %931 = vsyncadd [#allocation6], 4294966656 }
  0x13   :  { %932 = dma.done.wait [#allocation9], 256  }
  0x14   :  { %933 = vsyncadd [#allocation9], 4294967040  ;;  %v103_v0 = vld [vmem:[#allocation7 + $0x18] sm:$0xff]  ;;  %v171_v1 = vld [vmem:[#allocation8 + $0x8] sm:$0xff]  ;;  %vm176_vm0 = vcmask 130048   ;;  %vm104_vm1 = vcmask 261120  }
  0x15   :  { %v102_v2 = vld [vmem:[#allocation7 + $0x10] sm:$0xff]  ;;  %729 = vmatpush.msra.mxu2 %v103_v0  ;;  %730 = vmatpush.msra.mxu3 %v103_v0  ;;  %v170_v3 = vld [vmem:[#allocation8] sm:$0xff]  ;;  %v99_v4 = vld [vmem:[#allocation5] sm:$0xff]  ;;  %vm299_vm2 = vcmask 1041409   ;;  %vm301_vm3 = vcmask 1042434   ;;  %vm303_vm4 = vcmask 1043459  }
  0x16   :  { %194 = vmatpush.msra.mxu1 %v171_v1  ;;  %141 = vmatpush.msra.mxu0 %v103_v0  ;;  %v101_v5 = vld [vmem:[#allocation7 + $0x8] sm:$0xff]  ;;  %v100_v6 = vld [vmem:[#allocation7] sm:$0xff]  ;;  %v1008_v9 = vld [vmem:[#allocation2] sm:$0xff]  ;;  %vm305_vm5 = vcmask 1044484   ;;  %vm307_vm6 = vcmask 1045509   ;;  %vm1278_vm7 = vcmask 1046534  }
  0x17   :  { %731 = vmatpush.msra.mxu2 %v102_v2  ;;  %732 = vmatpush.msra.mxu3 %v102_v2  ;;  %v1004_v7 = vld [vmem:[#allocation2 + $0x10] sm:$0xff]  ;;  %v1006_v8 = vld [vmem:[#allocation2 + $0x28] sm:$0xff]  ;;  %v1016_v10 = vld [vmem:[#allocation2 + $0x18] sm:$0xff]  ;;  %vm1277_vm8 = vcmask 1047559   ;;  %vm1276_vm9 = vcmask 64512   ;;  %s703_s30 = sshll.u32 %s1275_s8, 4  ;;  %s704_s30 = int_to_ptr.hbm [resolvable:$true] %s703_s30 }
  0x18   :  { %195 = vmatpush.msra.mxu1 %v170_v3  ;;  %142 = vmatpush.msra.mxu0 %v102_v2  ;;  %v1018_v11 = vld [vmem:[#allocation2 + $0x30] sm:$0xff]  ;;  %v1020_v12 = vld [vmem:[#allocation2 + $0x8] sm:$0xff]  ;;  %v1028_v13 = vld [vmem:[#allocation2 + $0x20] sm:$0xff]  ;;  %s946_s8 = smov [#allocation10]   ;;  %s692_s12 = sshll.u32 %s1274_s7, 4  ;;  %s693_s12 = int_to_ptr.hbm [resolvable:$true] %s692_s12 }
  0x19   :  { %728 = vmatmul.msk.f32.vlgmr.msra.gmra.mxu1 %vm176_vm0, %v99_v4  ;;  %733 = vmatpush.msra.mxu2 %v101_v5  ;;  %v1030_v14 = vld [vmem:[#allocation2 + $0x38] sm:$0xff]  ;;  %v749_v15 = vld [vmem:[%s1270_s3] ss:$0 sm:$0xff]  ;;  %s945_s3 = smov [#allocation11]   ;;  %s690_s9 = sshll.u32 %s946_s8, 4  ;;  %s691_s9 = int_to_ptr.vmem [resolvable:$true] %s690_s9 }
  0x1a   :  { %734 = vmatpush.msra.mxu3 %v101_v5  ;;  %143 = vmatpush.msra.mxu0 %v101_v5  ;;  %v750_v16 = vld [vmem:[%s1272_s5] ss:$0 sm:$0xff]  ;;  %s701_s5 = sshll.u32 %s945_s3, 4  ;;  %s702_s5 = int_to_ptr.vmem [resolvable:$true] %s701_s5 }
  0x1b   :  { %735 = vmatpush.msra.mxu2 %v100_v6  ;;  %v751_v26 = vld [vmem:[%s1273_s6] ss:$0 sm:$0xff] }
  0x1c   :  { %736 = vmatpush.msra.mxu3 %v100_v6  ;;  %722 = vmatmul.msk.f32.vlgmr.msra.gmra.mxu2 %vm104_vm1, %v1004_v7 }
  0x1d   :  { %725 = vmatmul.msk.f32.vlgmr.msra.gmra.mxu3 %vm104_vm1, %v1006_v8  ;;  %144 = vmatpush.msra.mxu0 %v100_v6 }
  0x1e   :  { %720 = vmatmul.msk.f32.vlgmr.msra.gmra.mxu0 %vm104_vm1, %v1008_v9 }
  0x24   :  { %723 = vmatmul.msk.f32.gmra.mxu2 %vm104_vm1, %v1016_v10 }
  0x25   :  { %726 = vmatmul.msk.f32.gmra.mxu3 %vm104_vm1, %v1018_v11 }
  0x26   :  { %721 = vmatmul.msk.f32.gmra.mxu0 %vm104_vm1, %v1020_v12 }
  0x2c   :  { %724 = vmatmul.msk.f32.gmra.mxu2 %vm104_vm1, %v1028_v13 }
  0x2d   :  { %727 = vmatmul.msk.f32.gmra.mxu3 %vm104_vm1, %v1030_v14 }
  0x96   :  { %v197_v17 = vpop.f32.mrf.mxu1 }
  0x97   :  { %v198_v18 = vadd.f32 %v749_v15, %v197_v17 }
  0x99   :  { %v204_v19 = vadd.f32 %v750_v16, %v198_v18 }
  0x9b   :  { %v146_v20 = vpop.f32.mrf.mxu0  ;;  %v213_v21 = vperm.slane %v204_v19, 0  ;;  %v207_v22 = vrot.slane %v204_v19, 2  ;;  %v206_v23 = vrot.slane %v204_v19, 1  ;;  %v208_v32 = vrot.slane %v204_v19, 3 }
  0x9c   :  { %v211_v34 = vrot.slane %v204_v19, 6  ;;  %v210_v49 = vrot.slane %v204_v19, 5  ;;  %v209_v52 = vrot.slane %v204_v19, 4  ;;  %v212_v54 = vrot.slane %v204_v19, 7 }
  0x9d   :  { %v229_v24 = vadd.f32 %v213_v21, %v146_v20  ;;  %v215_v25 = vperm.slane %v207_v22, 0  ;;  %v214_v31 = vperm.slane %v206_v23, 0  ;;  %v216_v40 = vperm.slane %v208_v32, 0 }
  0x9e   :  { %v219_v41 = vperm.slane %v211_v34, 0  ;;  %v218_v56 = vperm.slane %v210_v49, 0  ;;  %v217_v58 = vperm.slane %v209_v52, 0  ;;  %v220_v59 = vperm.slane %v212_v54, 0 }
  0x9f   :  { %v237_v27 = vmax.f32 %v229_v24, 0.0  ;;  %v152_v28 = vpop.f32.mrf.mxu2  ;;  %v289_v22 = vlaneseq }
  0xa0   :  { %v231_v29 = vadd.f32 %v215_v25, %v152_v28  ;;  %v161_v30 = vpop.f32.mrf.mxu3 }
  0xa1   :  { %v249_v33 = vmul.f32 %v751_v26, %v237_v27  ;;  %v234_v1 = vadd.f32 %v218_v56, %v161_v30  ;;  %v1053_v25 = vand.u32 127, %v289_v22 }
  0xa2   :  { %v239_v35 = vmax.f32 %v231_v29, 0.0 }
  0xa3   :  { %v257_v36 = vsel %vm104_vm1, %v249_v33, 0.0  ;;  %v149_v37 = vpop.f32.mrf.mxu0  ;;  %v242_v15 = vmax.f32 %v234_v1, 0.0 }
  0xa4   :  { %258 = vadd.xlane.f32.xlu0 %v257_v36  ;;  %v230_v38 = vadd.f32 %v214_v31, %v149_v37  ;;  %v251_v39 = vmul.f32 %v751_v26, %v239_v35 }
  0xa5   :  { %v254_v18 = vmul.f32 %v751_v26, %v242_v15 }
  0xa6   :  { %v238_v42 = vmax.f32 %v230_v38, 0.0  ;;  %v263_v43 = vsel %vm104_vm1, %v251_v39, 0.0 }
  0xa7   :  { %264 = vadd.xlane.f32.xlu1 %v263_v43  ;;  %v155_v44 = vpop.f32.mrf.mxu2  ;;  %v272_v19 = vsel %vm104_vm1, %v254_v18, 0.0 }
  0xa8   :  { %v164_v45 = vpop.f32.mrf.mxu3  ;;  %v232_v46 = vadd.f32 %v216_v40, %v155_v44  ;;  %v250_v47 = vmul.f32 %v751_v26, %v238_v42 }
  0xa9   :  { %v235_v48 = vadd.f32 %v219_v41, %v164_v45 }
  0xaa   :  { %v240_v50 = vmax.f32 %v232_v46, 0.0  ;;  %v260_v51 = vsel %vm104_vm1, %v250_v47, 0.0  ;;  %v944_v46 = vmov 0  }
  0xab   :  { %v243_v53 = vmax.f32 %v235_v48, 0.0  ;;  %748 = vset.pattern.permute.xlu2 %v944_v46  ;;  %747 = vset.pattern.permute.xlu1 %v944_v46 }
  0xac   :  { %261 = vadd.xlane.f32.xlu0 %v260_v51  ;;  %v252_v55 = vmul.f32 %v751_v26, %v240_v50 }
  0xad   :  { %v255_v61 = vmul.f32 %v751_v26, %v243_v53  ;;  %746 = vset.pattern.permute.xlu0 %v944_v46 }
  0xae   :  { %v266_v57 = vsel %vm104_vm1, %v252_v55, 0.0 }
  0xaf   :  { %267 = vadd.xlane.f32.xlu1 %v266_v57  ;;  %v158_v60 = vpop.f32.mrf.mxu2  ;;  %v275_v4 = vsel %vm104_vm1, %v255_v61, 0.0 }
  0xb0   :  { %v167_v62 = vpop.f32.mrf.mxu3  ;;  %v233_v63 = vadd.f32 %v217_v58, %v158_v60 }
  0xb1   :  { %v236_v0 = vadd.f32 %v220_v59, %v167_v62 }
  0xb2   :  { %v241_v2 = vmax.f32 %v233_v63, 0.0 }
  0xb3   :  { %v244_v3 = vmax.f32 %v236_v0, 0.0 }
  0xb4   :  { %276 = vadd.xlane.f32.xlu0 %v275_v4  ;;  %v253_v5 = vmul.f32 %v751_v26, %v241_v2 }
  0xb5   :  { %v256_v6 = vmul.f32 %v751_v26, %v244_v3 }
  0xb6   :  { %v269_v16 = vsel %vm104_vm1, %v253_v5, 0.0 }
  0xb7   :  { %v278_v17 = vsel %vm104_vm1, %v256_v6, 0.0  ;;  %270 = vadd.xlane.f32.xlu2 %v269_v16 }
  0xb8   :  { %279 = vadd.xlane.f32.xlu1 %v278_v17 }
  0xbf   :  { %273 = vadd.xlane.f32.xlu2 %v272_v19 }
 0x117   :  { %v259_v20 = vpop.xlane.xlu0 %258 }
 0x118   :  { %v291_v28 = vperm.slane %v259_v20, %v1053_v25 }
 0x11a   :  { %v265_v21 = vpop.xlane.xlu1 %264 }
 0x11b   :  { %v293_v31 = vperm.slane %v265_v21, %v1053_v25 }
 0x11f   :  { %v262_v23 = vpop.xlane.xlu0 %261 }
 0x120   :  { %v292_v29 = vperm.slane %v262_v23, %v1053_v25 }
 0x122   :  { %v268_v24 = vpop.xlane.xlu1 %267  ;;  %v300_v30 = vsel %vm299_vm2, %v292_v29, %v291_v28 }
 0x123   :  { %v294_v26 = vperm.slane %v268_v24, %v1053_v25  ;;  %v302_v34 = vsel %vm301_vm3, %v293_v31, %v300_v30 }
 0x125   :  { %v304_v37 = vsel %vm303_vm4, %v294_v26, %v302_v34 }
 0x127   :  { %v277_v33 = vpop.xlane.xlu0 %276 }
 0x128   :  { %v297_v39 = vperm.slane %v277_v33, %v1053_v25 }
 0x12a   :  { %v271_v27 = vpop.xlane.xlu2 %270 }
 0x12b   :  { %v295_v32 = vperm.slane %v271_v27, %v1053_v25  ;;  %v280_v35 = vpop.xlane.xlu1 %279 }
 0x12c   :  { %v298_v41 = vperm.slane %v280_v35, %v1053_v25 }
 0x12d   :  { %v306_v40 = vsel %vm305_vm5, %v295_v32, %v304_v37 }
 0x132   :  { %v274_v36 = vpop.xlane.xlu2 %273 }
 0x133   :  { %v296_v38 = vperm.slane %v274_v36, %v1053_v25 }
 0x135   :  { %v308_v42 = vsel %vm307_vm6, %v296_v38, %v306_v40 }
 0x136   :  { %v310_v43 = vsel %vm1278_vm7, %v297_v39, %v308_v42 }
 0x137   :  { %v312_v44 = vsel %vm1277_vm8, %v298_v41, %v310_v43 }
 0x138   :  { %v315_v45 = vsel %vm1276_vm9, %v312_v44, -inf }
 0x139   :  { %316 = vmax.xlane.f32.xlu2 %v315_v45 }
 0x1ac   :  { %v317_v47 = vpop.xlane.xlu2 %316 }
 0x1ad   :  { %v321_v48 = vperm.slane %v317_v47, 2  ;;  %v320_v49 = vperm.slane %v317_v47, 1  ;;  %v319_v50 = vperm.slane %v317_v47, 0  ;;  %v322_v54 = vperm.slane %v317_v47, 3 }
 0x1ae   :  { %v323_v55 = vperm.slane %v317_v47, 4  ;;  %v326_v56 = vperm.slane %v317_v47, 7  ;;  %v324_v0 = vperm.slane %v317_v47, 5  ;;  %v325_v2 = vperm.slane %v317_v47, 6 }
 0x1af   :  { %v337_v51 = vsub.f32 %v265_v21, %v321_v48  ;;  %v336_v52 = vsub.f32 %v262_v23, %v320_v49  ;;  %v335_v53 = vsub.f32 %v259_v20, %v319_v50  ;;  %v338_v60 = vsub.f32 %v268_v24, %v322_v54 }
 0x1b0   :  { %v339_v61 = vsub.f32 %v271_v27, %v323_v55  ;;  %v342_v62 = vsub.f32 %v280_v35, %v326_v56  ;;  %v340_v15 = vsub.f32 %v274_v36, %v324_v0  ;;  %v341_v16 = vsub.f32 %v277_v33, %v325_v2 }
 0x1b1   :  { %v347_v57 = vmul.f32 1.442695, %v337_v51  ;;  %v345_v58 = vmul.f32 1.442695, %v336_v52  ;;  %v343_v59 = vmul.f32 1.442695, %v335_v53 }
 0x1b2   :  { %v349_v63 = vmul.f32 1.442695, %v338_v60  ;;  %v351_v1 = vmul.f32 1.442695, %v339_v61  ;;  %v357_v4 = vmul.f32 1.442695, %v342_v62 }
 0x1b3   :  { %752 = vpow2.f32 %v347_v57  ;;  %v353_v17 = vmul.f32 1.442695, %v340_v15  ;;  %v355_v18 = vmul.f32 1.442695, %v341_v16 }
 0x1b4   :  { %754 = vpow2.f32 %v345_v58 }
 0x1b5   :  { %756 = vpow2.f32 %v343_v59 }
 0x1b6   :  { %758 = vpow2.f32 %v349_v63 }
 0x1b7   :  { %760 = vpow2.f32 %v351_v1 }
 0x1b8   :  { %762 = vpow2.f32 %v357_v4 }
 0x1b9   :  { %v1071_v3 = vpop.eup %752  ;;  %764 = vpow2.f32 %v353_v17 }
 0x1ba   :  { %v1073_v5 = vpop.eup %754  ;;  %374 = vperm.xlu2 %748, %v1071_v3   ;;  %766 = vpow2.f32 %v355_v18 }
 0x1bb   :  { %v1076_v6 = vpop.eup %756  ;;  %371 = vperm.xlu1 %747, %v1073_v5  }
 0x1bc   :  { %368 = vperm.xlu0 %746, %v1076_v6   ;;  %v1080_v19 = vpop.eup %758 }
 0x1bd   :  { %v1082_v20 = vpop.eup %760 }
 0x1be   :  { %v1085_v21 = vpop.eup %762 }
 0x1bf   :  { %v1089_v22 = vpop.eup %764 }
 0x1c0   :  { %v1091_v23 = vpop.eup %766 }
 0x1c2   :  { %377 = vperm.xlu2 %748, %v1080_v19  }
 0x1c3   :  { %380 = vperm.xlu1 %747, %v1082_v20  }
 0x1c4   :  { %389 = vperm.xlu0 %746, %v1085_v21  }
 0x1ca   :  { %383 = vperm.xlu2 %748, %v1089_v22  }
 0x1cb   :  { %386 = vperm.xlu1 %747, %v1091_v23  }
 0x214   :  { %v375_v24 = vpop.permute.xlu2 %374 }
 0x215   :  { %v393_v33 = vperm.slane %v375_v24, %v1053_v25 }
 0x21c   :  { %v378_v29 = vpop.permute.xlu2 %377 }
 0x21d   :  { %v394_v36 = vperm.slane %v378_v29, %v1053_v25 }
 0x224   :  { %v384_v37 = vpop.permute.xlu2 %383 }
 0x225   :  { %v396_v41 = vperm.slane %v384_v37, %v1053_v25 }
 0x22d   :  { %v372_v27 = vpop.permute.xlu1 %371 }
 0x22e   :  { %v369_v28 = vpop.permute.xlu0 %368  ;;  %v392_v30 = vperm.slane %v372_v27, %v1053_v25 }
 0x22f   :  { %v391_v26 = vperm.slane %v369_v28, %v1053_v25 }
 0x231   :  { %v399_v31 = vsel %vm299_vm2, %v392_v30, %v391_v26 }
 0x232   :  { %v400_v34 = vsel %vm301_vm3, %v393_v33, %v399_v31 }
 0x233   :  { %v401_v38 = vsel %vm303_vm4, %v394_v36, %v400_v34 }
 0x235   :  { %v381_v32 = vpop.permute.xlu1 %380 }
 0x236   :  { %v395_v35 = vperm.slane %v381_v32, %v1053_v25  ;;  %v390_v40 = vpop.permute.xlu0 %389 }
 0x237   :  { %v398_v44 = vperm.slane %v390_v40, %v1053_v25 }
 0x238   :  { %v402_v39 = vsel %vm305_vm5, %v395_v35, %v401_v38 }
 0x239   :  { %v403_v45 = vsel %vm307_vm6, %v396_v41, %v402_v39 }
 0x23d   :  { %v387_v42 = vpop.permute.xlu1 %386 }
 0x23e   :  { %v397_v43 = vperm.slane %v387_v42, %v1053_v25 }
 0x240   :  { %v404_v46 = vsel %vm1278_vm7, %v397_v43, %v403_v45 }
 0x241   :  { %v405_v47 = vsel %vm1277_vm8, %v398_v44, %v404_v46 }
 0x242   :  { %v407_v48 = vsel %vm1276_vm9, %v405_v47, 0.0 }
 0x243   :  { %408 = vadd.xlane.f32.xlu2 %v407_v48 }
 0x2b6   :  { %v409_v49 = vpop.xlane.xlu2 %408 }
 0x2b7   :  { %v411_v50 = vperm.slane %v409_v49, 0  ;;  %v412_v51 = vperm.slane %v409_v49, 1  ;;  %v1111_v52 = vperm.slane %v409_v49, 2  ;;  %v1113_v53 = vperm.slane %v409_v49, 3 }
 0x2b8   :  { %v1115_v54 = vperm.slane %v409_v49, 4  ;;  %v1117_v55 = vperm.slane %v409_v49, 5  ;;  %v1123_v60 = vperm.slane %v409_v49, 7  ;;  %v1125_v63 = vperm.slane %v409_v49, 6 }
 0x2b9   :  { %768 = vrcp.f32 %v411_v50  ;;  %v451_v56 = vand.u32 2147483647, %v412_v51  ;;  %v453_v57 = vand.u32 2147483648, %v412_v51  ;;  %v436_v58 = vand.u32 2147483647, %v411_v50 }
 0x2ba   :  { %770 = vrcp.f32 %v412_v51  ;;  %v438_v61 = vand.u32 2147483648, %v411_v50  ;;  %vm447_vm10 = vweird.f32 %v412_v51  ;;  %vm432_vm12 = vweird.f32 %v411_v50 }
 0x2bb   :  { %772 = vrcp.f32 %v1111_v52  ;;  %vm1129_vm11 = vcmp.eq.f32.partialorder %v451_v56, 8.507059e+37  ;;  %v454_v16 = vor.u32 1.1754944e-38, %v453_v57  ;;  %vm1135_vm13 = vcmp.eq.f32.partialorder %v436_v58, 8.507059e+37 }
 0x2bc   :  { %774 = vrcp.f32 %v1113_v53  ;;  %v439_v29 = vor.u32 1.1754944e-38, %v438_v61  ;;  %v483_v38 = vand.u32 2147483648, %v1113_v53  ;;  %v468_v40 = vand.u32 2147483648, %v1111_v52 }
 0x2bd   :  { %776 = vrcp.f32 %v1115_v54  ;;  %v466_v57 = vand.u32 2147483647, %v1111_v52 }
 0x2be   :  { %778 = vrcp.f32 %v1117_v55 }
 0x2bf   :  { %v769_v59 = vpop.eup %768  ;;  %780 = vrcp.f32 %v1123_v60 }
 0x2c0   :  { %v771_v62 = vpop.eup %770  ;;  %v428_v0 = vmul.f32 %v769_v59, %v411_v50  ;;  %vm433_vm14 = vweird.f32 %v769_v59  ;;  %782 = vrcp.f32 %v1125_v63 }
 0x2c1   :  { %v1127_v1 = vpop.eup %772  ;;  %v443_v2 = vmul.f32 %v771_v62, %v412_v51  ;;  %vm448_vm15 = vweird.f32 %v771_v62  ;;  %vm434_vm0 = vmor %vm432_vm12, %vm433_vm14  ;;  %vm477_vm12 = vweird.f32 %v1113_v53 }
 0x2c2   :  { %v1133_v15 = vpop.eup %774  ;;  %v429_v17 = vsub.f32 1.0, %v428_v0  ;;  %v458_v24 = vmul.f32 %v1127_v1, %v1111_v52  ;;  %vm463_vm9 = vweird.f32 %v1127_v1  ;;  %vm449_vm8 = vmor %vm447_vm10, %vm448_vm15  ;;  %vm462_vm10 = vweird.f32 %v1111_v52 }
 0x2c3   :  { %v1141_v27 = vpop.eup %776  ;;  %v444_v28 = vsub.f32 1.0, %v443_v2  ;;  %v473_v30 = vmul.f32 %v1133_v15, %v1113_v53  ;;  %vm478_vm7 = vweird.f32 %v1133_v15  ;;  %v469_v52 = vor.u32 1.1754944e-38, %v468_v40 }
 0x2c4   :  { %v1146_v26 = vpop.eup %778  ;;  %v430_v31 = vmul.f32 %v769_v59, %v429_v17  ;;  %v459_v32 = vsub.f32 1.0, %v458_v24  ;;  %v488_v33 = vmul.f32 %v1141_v27, %v1115_v54  ;;  %v484_v2 = vor.u32 1.1754944e-38, %v483_v38 }
 0x2c5   :  { %v445_v34 = vmul.f32 %v771_v62, %v444_v28  ;;  %v474_v35 = vsub.f32 1.0, %v473_v30  ;;  %v503_v36 = vmul.f32 %v1146_v26, %v1117_v55  ;;  %v1162_v46 = vpop.eup %780  ;;  %vm508_vm14 = vweird.f32 %v1146_v26 }
 0x2c6   :  { %v431_v37 = vadd.f32 %v769_v59, %v430_v31  ;;  %v460_v39 = vmul.f32 %v1127_v1, %v459_v32  ;;  %v489_v45 = vsub.f32 1.0, %v488_v33  ;;  %v498_v24 = vand.u32 2147483648, %v1115_v54 }
 0x2c7   :  { %v446_v41 = vadd.f32 %v771_v62, %v445_v34  ;;  %v475_v42 = vmul.f32 %v1133_v15, %v474_v35  ;;  %v504_v50 = vsub.f32 1.0, %v503_v36  ;;  %vm492_vm15 = vweird.f32 %v1115_v54 }
 0x2c8   :  { %v435_v43 = vsel %vm434_vm0, %v769_v59, %v431_v37  ;;  %v461_v44 = vadd.f32 %v1127_v1, %v460_v39  ;;  %v481_v59 = vand.u32 2147483647, %v1113_v53  ;;  %v533_v53 = vmul.f32 %v1162_v46, %v1123_v60 }
 0x2c9   :  { %v450_v47 = vsel %vm449_vm8, %v771_v62, %v446_v41  ;;  %v440_v48 = vsel %vm1135_vm13, %v439_v29, %v435_v43  ;;  %v476_v49 = vadd.f32 %v1133_v15, %v475_v42  ;;  %vm464_vm8 = vmor %vm462_vm10, %vm463_vm9  ;;  %v1181_v62 = vpop.eup %782  ;;  %v505_v0 = vmul.f32 %v1146_v26, %v504_v50 }
 0x2ca   :  { %v455_v56 = vsel %vm1129_vm11, %v454_v16, %v450_v47  ;;  %v441_v51 = vmul.f32 %v1076_v6, %v440_v48  ;;  %vm479_vm13 = vmor %vm477_vm12, %vm478_vm7  ;;  %v465_v61 = vsel %vm464_vm8, %v1127_v1, %v461_v44  ;;  %v490_v6 = vmul.f32 %v1141_v27, %v489_v45 }
 0x2cb   :  { %v456_v58 = vmul.f32 %v1073_v5, %v455_v56  ;;  %v480_v5 = vsel %vm479_vm13, %v1133_v15, %v476_v49  ;;  %vm467_vm9 = vcmp.eq.f32.partialorder %v466_v57, 8.507059e+37  ;;  %vm482_vm11 = vcmp.eq.f32.partialorder %v481_v59, 8.507059e+37 }
 0x2cc   :  { %549 = vperm.xlu1 %747, %v441_v51   ;;  %v470_v4 = vsel %vm467_vm9, %v469_v52, %v465_v61  ;;  %v513_v16 = vand.u32 2147483648, %v1117_v55  ;;  %v485_v1 = vsel %vm482_vm11, %v484_v2, %v480_v5  ;;  %v491_v17 = vadd.f32 %v1141_v27, %v490_v6 }
 0x2cd   :  { %554 = vperm.xlu0 %746, %v456_v58   ;;  %vm493_vm7 = vweird.f32 %v1141_v27  ;;  %v518_v15 = vmul.f32 %v1181_v62, %v1125_v63  ;;  %v506_v18 = vadd.f32 %v1146_v26, %v505_v0  ;;  %v534_v28 = vsub.f32 1.0, %v533_v53 }
 0x2ce   :  { %v471_v29 = vmul.f32 %v1071_v3, %v470_v4  ;;  %v496_v30 = vand.u32 2147483647, %v1115_v54  ;;  %v486_v32 = vmul.f32 %v1080_v19, %v485_v1  ;;  %vm507_vm0 = vweird.f32 %v1117_v55  ;;  %vm494_vm10 = vmor %vm492_vm15, %vm493_vm7 }
 0x2cf   :  { %v519_v31 = vsub.f32 1.0, %v518_v15  ;;  %v511_v33 = vand.u32 2147483647, %v1117_v55  ;;  %vm509_vm12 = vmor %vm507_vm0, %vm508_vm14  ;;  %v495_v34 = vsel %vm494_vm10, %v1141_v27, %v491_v17  ;;  %v499_v36 = vor.u32 1.1754944e-38, %v498_v24 }
 0x2d0   :  { %v510_v3 = vsel %vm509_vm12, %v1146_v26, %v506_v18  ;;  %v535_v54 = vmul.f32 %v1162_v46, %v534_v28  ;;  %v514_v37 = vor.u32 1.1754944e-38, %v513_v16  ;;  %vm497_vm8 = vcmp.eq.f32.partialorder %v496_v30, 8.507059e+37 }
 0x2d1   :  { %v520_v35 = vmul.f32 %v1181_v62, %v519_v31  ;;  %vm512_vm13 = vcmp.eq.f32.partialorder %v511_v33, 8.507059e+37  ;;  %v500_v19 = vsel %vm497_vm8, %v499_v36, %v495_v34  ;;  %vm523_vm9 = vweird.f32 %v1181_v62 }
 0x2d2   :  { %v515_v38 = vsel %vm512_vm13, %v514_v37, %v510_v3  ;;  %v536_v39 = vadd.f32 %v1162_v46, %v535_v54  ;;  %vm538_vm11 = vweird.f32 %v1162_v46  ;;  %v528_v27 = vand.u32 2147483648, %v1125_v63 }
 0x2d3   :  { %v521_v55 = vadd.f32 %v1181_v62, %v520_v35  ;;  %v501_v26 = vmul.f32 %v1082_v20, %v500_v19  ;;  %v543_v40 = vand.u32 2147483648, %v1123_v60  ;;  %vm522_vm7 = vweird.f32 %v1125_v63 }
 0x2d4   :  { %559 = vperm.xlu1 %747, %v471_v29   ;;  %v526_v41 = vand.u32 2147483647, %v1125_v63  ;;  %v516_v42 = vmul.f32 %v1089_v22, %v515_v38  ;;  %vm537_vm14 = vweird.f32 %v1123_v60  ;;  %v541_v43 = vand.u32 2147483647, %v1123_v60  ;;  %vm524_vm15 = vmor %vm522_vm7, %vm523_vm9 }
 0x2d5   :  { %564 = vperm.xlu0 %746, %v486_v32   ;;  %vm539_vm0 = vmor %vm537_vm14, %vm538_vm11  ;;  %v525_v44 = vsel %vm524_vm15, %v1181_v62, %v521_v55  ;;  %v529_v45 = vor.u32 1.1754944e-38, %v528_v27  ;;  %v544_v47 = vor.u32 1.1754944e-38, %v543_v40  ;;  %vm1283_vm8 = vcmask 1046534  }
 0x2d6   :  { %v540_v20 = vsel %vm539_vm0, %v1162_v46, %v536_v39  ;;  %vm527_vm10 = vcmp.eq.f32.partialorder %v526_v41, 8.507059e+37  ;;  %vm542_vm12 = vcmp.eq.f32.partialorder %v541_v43, 8.507059e+37  ;;  %vm1284_vm13 = vcmask 1047559  }
 0x2d7   :  { %v530_v48 = vsel %vm527_vm10, %v529_v45, %v525_v44  ;;  %v545_v63 = vsel %vm542_vm12, %v544_v47, %v540_v20  ;;  %vm1285_vm9 = vcmask 64512  }
 0x2d8   :  { %v531_v22 = vmul.f32 %v1091_v23, %v530_v48  ;;  %v546_v49 = vmul.f32 %v1085_v21, %v545_v63 }
 0x2dc   :  { %569 = vperm.xlu1 %747, %v501_v26  }
 0x2dd   :  { %574 = vperm.xlu0 %746, %v516_v42  }
 0x2e4   :  { %579 = vperm.xlu1 %747, %v531_v22  }
 0x2e5   :  { %584 = vperm.xlu0 %746, %v546_v49  }
 0x33e   :  { %v550_v60 = vpop.permute.xlu1 %549 }
 0x33f   :  { %v555_v50 = vpop.permute.xlu0 %554  ;;  %v587_v56 = vmul.f32 %v550_v60, %v1008_v9  ;;  %v668_v4 = vperm.slane %v550_v60, %v1053_v25 }
 0x340   :  { %v588_v51 = vmul.f32 %v555_v50, %v1020_v12  ;;  %v669_v2 = vperm.slane %v555_v50, %v1053_v25 }
 0x341   :  { %v595_v46 = vsel %vm104_vm1, %v587_v56, 0.0 }
 0x342   :  { %v602_v57 = vsel %vm104_vm1, %v588_v51, 0.0  ;;  %v596_v58 = vrot.slane %v595_v46, 4  ;;  %v676_v28 = vsel %vm299_vm2, %v669_v2, %v668_v4 }
 0x343   :  { %v603_v59 = vrot.slane %v602_v57, 4 }
 0x344   :  { %v597_v6 = vadd.f32 %v596_v58, %v595_v46 }
 0x345   :  { %v604_v61 = vadd.f32 %v603_v59, %v602_v57 }
 0x346   :  { %v560_v62 = vpop.permute.xlu1 %559  ;;  %v598_v9 = vrot.slane %v597_v6, 2 }
 0x347   :  { %v565_v23 = vpop.permute.xlu0 %564  ;;  %v589_v21 = vmul.f32 %v560_v62, %v1004_v7  ;;  %v605_v0 = vrot.slane %v604_v61, 2  ;;  %v670_v17 = vperm.slane %v560_v62, %v1053_v25 }
 0x348   :  { %v590_v5 = vmul.f32 %v565_v23, %v1016_v10  ;;  %v599_v7 = vadd.f32 %v598_v9, %v597_v6  ;;  %v671_v29 = vperm.slane %v565_v23, %v1053_v25 }
 0x349   :  { %v609_v52 = vsel %vm104_vm1, %v589_v21, 0.0  ;;  %v606_v18 = vadd.f32 %v605_v0, %v604_v61  ;;  %v677_v33 = vsel %vm301_vm3, %v670_v17, %v676_v28 }
 0x34a   :  { %v616_v12 = vsel %vm104_vm1, %v590_v5, 0.0  ;;  %v610_v53 = vrot.slane %v609_v52, 4  ;;  %v600_v37 = vrot.slane %v599_v7, 1 }
 0x34b   :  { %v617_v16 = vrot.slane %v616_v12, 4  ;;  %v607_v54 = vrot.slane %v606_v18, 1 }
 0x34c   :  { %v611_v1 = vadd.f32 %v610_v53, %v609_v52  ;;  %v601_v43 = vadd.f32 %v600_v37, %v599_v7 }
 0x34d   :  { %v618_v15 = vadd.f32 %v617_v16, %v616_v12  ;;  %v608_v42 = vadd.f32 %v607_v54, %v606_v18 }
 0x34e   :  { %v612_v24 = vrot.slane %v611_v1, 2  ;;  %v570_v10 = vpop.permute.xlu1 %569 }
 0x34f   :  { %v575_v30 = vpop.permute.xlu0 %574  ;;  %v591_v31 = vmul.f32 %v570_v10, %v1028_v13  ;;  %v619_v32 = vrot.slane %v618_v15, 2  ;;  %v672_v35 = vperm.slane %v570_v10, %v1053_v25  ;;  %v678_v13 = vsel %vm303_vm4, %v671_v29, %v677_v33 }
 0x350   :  { %v592_v34 = vmul.f32 %v575_v30, %v1006_v8  ;;  %v613_v3 = vadd.f32 %v612_v24, %v611_v1  ;;  %v673_v39 = vperm.slane %v575_v30, %v1053_v25 }
 0x351   :  { %v623_v36 = vsel %vm104_vm1, %v591_v31, 0.0  ;;  %v620_v27 = vadd.f32 %v619_v32, %v618_v15  ;;  %v679_v40 = vsel %vm305_vm5, %v672_v35, %v678_v13 }
 0x352   :  { %v630_v19 = vsel %vm104_vm1, %v592_v34, 0.0  ;;  %v624_v38 = vrot.slane %v623_v36, 4  ;;  %v614_v8 = vrot.slane %v613_v3, 1  ;;  %v680_v48 = vsel %vm307_vm6, %v673_v39, %v679_v40 }
 0x353   :  { %v631_v55 = vrot.slane %v630_v19, 4  ;;  %v621_v49 = vrot.slane %v620_v27, 1 }
 0x354   :  { %v625_v26 = vadd.f32 %v624_v38, %v623_v36  ;;  %v615_v51 = vadd.f32 %v614_v8, %v613_v3 }
 0x355   :  { %v632_v41 = vadd.f32 %v631_v55, %v630_v19  ;;  %v622_v23 = vadd.f32 %v621_v49, %v620_v27 }
 0x356   :  { %v626_v44 = vrot.slane %v625_v26, 2  ;;  %v580_v20 = vpop.permute.xlu1 %579 }
 0x357   :  { %v633_v45 = vrot.slane %v632_v41, 2  ;;  %v585_v47 = vpop.permute.xlu0 %584  ;;  %v593_v63 = vmul.f32 %v580_v20, %v1018_v11  ;;  %v674_v22 = vperm.slane %v580_v20, %v1053_v25 }
 0x358   :  { %v627_v60 = vadd.f32 %v626_v44, %v625_v26  ;;  %v594_v50 = vmul.f32 %v585_v47, %v1030_v14  ;;  %v675_v56 = vperm.slane %v585_v47, %v1053_v25  ;;  %v659_v25 = vsel %vm299_vm2, %v608_v42, %v601_v43  ;;  %vm1286_vm2 = vmmov %vm1283_vm8 }
 0x359   :  { %v634_v46 = vadd.f32 %v633_v45, %v632_v41  ;;  %v637_v57 = vsel %vm104_vm1, %v593_v63, 0.0  ;;  %v681_v58 = vsel %vm1283_vm8, %v674_v22, %v680_v48  ;;  %v660_v52 = vsel %vm301_vm3, %v615_v51, %v659_v25  ;;  %vm1287_vm3 = vmmov %vm1284_vm13 }
 0x35a   :  { %v628_v59 = vrot.slane %v627_v60, 1  ;;  %v644_v61 = vsel %vm104_vm1, %v594_v50, 0.0  ;;  %v638_v11 = vrot.slane %v637_v57, 4  ;;  %v682_v6 = vsel %vm1284_vm13, %v675_v56, %v681_v58 }
 0x35b   :  { %v645_v62 = vrot.slane %v644_v61, 4  ;;  %684 = vst.msk [vmem:[#allocation11] sm:$0xff] %vm1285_vm9, %v682_v6  ;;  %v635_v21 = vrot.slane %v634_v46, 1  ;;  %v661_v16 = vsel %vm303_vm4, %v622_v23, %v660_v52 }
 0x35c   :  { %v639_v14 = vadd.f32 %v638_v11, %v637_v57  ;;  %706 = dma.vmem_to_hbm [thread:$0]  %s702_s5, 128, %s704_s30, [#allocation12]   ;;  %v629_v0 = vadd.f32 %v628_v59, %v627_v60 }
 0x35d   :  { %v646_v5 = vadd.f32 %v645_v62, %v644_v61  ;;  %v636_v2 = vadd.f32 %v635_v21, %v634_v46 }
 0x35e   :  { %v640_v9 = vrot.slane %v639_v14, 2  ;;  %v662_v17 = vsel %vm305_vm5, %v629_v0, %v661_v16 }
 0x35f   :  { %v647_v12 = vrot.slane %v646_v5, 2  ;;  %v663_v24 = vsel %vm307_vm6, %v636_v2, %v662_v17 }
 0x360   :  { %v641_v53 = vadd.f32 %v640_v9, %v639_v14 }
 0x361   :  { %v648_v4 = vadd.f32 %v647_v12, %v646_v5 }
 0x362   :  { %v642_v1 = vrot.slane %v641_v53, 1 }
 0x363   :  { %v649_v15 = vrot.slane %v648_v4, 1 }
 0x364   :  { %v643_v18 = vadd.f32 %v642_v1, %v641_v53 }
 0x365   :  { %v650_v7 = vadd.f32 %v649_v15, %v648_v4 }
 0x366   :  { %v664_v10 = vsel %vm1286_vm2, %v643_v18, %v663_v24 }
 0x367   :  { %v665_v28 = vsel %vm1287_vm3, %v650_v7, %v664_v10 }
 0x368   :  { %667 = vst.msk [vmem:[#allocation10] sm:$0xff] %vm104_vm1, %v665_v28 }
 0x369   :  { %695 = dma.vmem_to_hbm [thread:$0]  %s691_s9, 128, %s693_s12, [#allocation4]  }
 0x36a   :  { %934 = dma.done.wait [#allocation4], 128  }
 0x36b   :  { %935 = vsyncadd [#allocation4], 4294967168 }
 0x36c   :  { %936 = dma.done.wait [#allocation12], 128  }
 0x36d   :  { %937 = vsyncadd [#allocation12], 4294967168 }
 0x36e   :  { %715 = vsyncpa [#allocation3], 1 }
 0x36f   :  { %716 = vsyncpa [#allocation6], 1 }
 0x370   :  { %717 = vsyncpa [#allocation9], 1 }
 0x371   :  { %718 = vsyncpa [#allocation4], 1 }
 0x372   :  { %719 = vsyncpa [#allocation12], 1 }

</bundles_post_ra>
